<compile_context>
chip_gen: v6e
topology: v6e:2x2x1
jax: 0.10.0
libtpu: 0.0.40
codegen_flags: <defaults>
</compile_context>

<pallas_src>
import functools

import jax
import jax.numpy as jnp
from jax import lax
from jax.experimental import pallas as pl
from jax.experimental.pallas import tpu as pltpu


def _elu(x):
    # ELU with alpha=1: x if x > 0 else exp(x) - 1  (clamp exp arg in the dead branch)
    return jnp.where(x > 0, x, jnp.exp(jnp.minimum(x, 0.0)) - 1.0)


def qmix_kernel(n_agents, embed_dim,
                sa_ref,     # (tile_b, SA1) bf16   [states || actions || 1], row-major
                q_ref,      # (A, tile_b)   f32    agent qs, batch on lanes
                wt_ref,     # (n_pad, SA1)  bf16   fused hypernet weights (+bias column)
                wv2_ref,    # (E, 1)        f32    V[2] weight (column)
                bv2_ref,    # (1, 1)        f32    V[2] bias
                out_ref):   # (1, tile_b)   f32    q_tot row (lane-dense)
    A, E = n_agents, embed_dim

    # Single fused hypernet matmul (NT form; bias already folded into the last K column):
    #   (n_pad, SA1) x (tile_b, SA1)^T -> (n_pad, tile_b); batch stays on lanes.
    h = lax.dot_general(
        wt_ref[...], sa_ref[...],
        dimension_numbers=(((1,), (1,)), ((), ())),
        preferred_element_type=jnp.float32)

    q_t = q_ref[...]

    # hidden = elu( sum_a q_a * |w1_a| + b1 )   -- one VPU broadcast-MAC per agent.
    hidden = h[A * E:A * E + E, :]                                  # hyper_b_1 rows (E, tb)
    for a in range(A):
        hidden = hidden + q_t[a:a + 1, :] * jnp.abs(h[a * E:(a + 1) * E, :])
    hidden = _elu(hidden)                                           # (E, tb)

    wf_abs = jnp.abs(h[A * E + E:A * E + 2 * E, :])                 # |hyper_w_final| (E, tb)
    vh = jnp.maximum(h[A * E + 2 * E:A * E + 3 * E, :], 0.0)        # ReLU(V[0](sa))  (E, tb)

    # Sublane reductions land directly in a lane-dense (1, tile_b) output row.
    y = jnp.sum(hidden * wf_abs, axis=0, keepdims=True)
    v = jnp.sum(vh * wv2_ref[...], axis=0, keepdims=True) + bv2_ref[...]
    out_ref[...] = y + v


def qmix_forward(agent_qs, states, actions_onehot, params, *, embed_dim, tile_b=1024):
    """agent_qs: (bs, T, A); states: (bs, T, S); actions_onehot: (bs, T, A, n_actions)."""
    assert tile_b % 128 == 0, "tile_b must be lane-aligned (multiple of 128)"
    bs, T, A = agent_qs.shape
    E = embed_dim

    # --- plain-JAX glue: flatten actions, concat with states, append a ones column
    #     (folds the hypernet biases into the contraction), flatten batch*time. ---
    actions = actions_onehot.reshape(bs, T, -1).astype(jnp.float32)
    ones = jnp.ones((bs, T, 1), jnp.float32)
    sa_aug = jnp.concatenate([states.astype(jnp.float32), actions, ones], axis=2)
    SA1 = sa_aug.shape[-1]          # SA + 1
    SA = SA1 - 1
    B = bs * T

    B_pad = ((B + tile_b - 1) // tile_b) * tile_b
    sa_flat = sa_aug.reshape(B, SA1).astype(jnp.bfloat16)   # row-major; NO HBM transpose
    q_flat = agent_qs.reshape(B, A).astype(jnp.float32)
    if B_pad != B:
        pad = B_pad - B
        sa_flat = jnp.pad(sa_flat, ((0, pad), (0, 0)))
        q_flat = jnp.pad(q_flat, ((0, pad), (0, 0)))
    q_t = q_flat.T                  # (A, B_pad): only A=4 rows -> negligible transpose

    # --- fuse all four SA projections (hyper_w_1, hyper_b_1, hyper_w_final, V[0])
    #     and their biases (last column) into one transposed (n_pad, SA1) matrix. ---
    (w1, bw1, wb1, bb1, wf, bf, wv1, bv1, wv2, bv2) = params
    w1_t = jnp.transpose(w1, (0, 2, 1)).reshape(A * E, SA)          # row a*E+e = w1[a, :, e]
    wt = jnp.concatenate([w1_t, wb1.T, wf.T, wv1.T], axis=0)        # (A*E + 3E, SA)
    bt = jnp.concatenate(
        [bw1.reshape(A * E, 1), bb1.T, bf.T, bv1.T], axis=0)        # (A*E + 3E, 1)
    wt_aug = jnp.concatenate([wt, bt], axis=1)                      # (A*E + 3E, SA+1)
    n_used = A * E + 3 * E
    n_pad = ((n_used + 7) // 8) * 8                                 # sublane alignment only (224 -> 224)
    if n_pad != n_used:
        wt_aug = jnp.pad(wt_aug, ((0, n_pad - n_used), (0, 0)))
    wt_aug = wt_aug.astype(jnp.bfloat16)

    grid = (B_pad // tile_b,)
    # Constant operands: block index never changes across the grid, so Pallas fetches
    # them once and skips the re-DMA on subsequent steps.
    const = lambda shape: pl.BlockSpec(shape, lambda i: (0,) * len(shape))

    out = pl.pallas_call(
        functools.partial(qmix_kernel, A, E),
        out_shape=jax.ShapeDtypeStruct((1, B_pad), jnp.float32),
        grid=grid,
        in_specs=[
            pl.BlockSpec((tile_b, SA1), lambda i: (i, 0)),          # states||actions||1 (bf16)
            pl.BlockSpec((A, tile_b), lambda i: (0, i)),            # agent qs (f32, batch on lanes)
            const((n_pad, SA1)),                                    # fused hypernet weight (bf16)
            const((E, 1)),                                          # V[2] weight (f32)
            const((1, 1)),                                          # V[2] bias (f32)
        ],
        out_specs=pl.BlockSpec((1, tile_b), lambda i: (0, i)),      # lane-dense output row
        compiler_params=pltpu.CompilerParams(
            dimension_semantics=("parallel",)),
    )(sa_flat, q_t, wt_aug, wv2, bv2)

    return out[0, :B].reshape(bs, T, 1)


def qmix_reference(agent_qs, states, actions_onehot, params, *, embed_dim, cast_bf16=False):
    """Pure-JAX reference mirroring the PyTorch forward.

    cast_bf16=True rounds the matmul inputs (sa + hypernet weights/biases) to bf16,
    exactly matching the kernel's precision so a tight tolerance can be used.
    """
    (w1, bw1, wb1, bb1, wf, bf, wv1, bv1, wv2, bv2) = params
    bs, T, n_agents = agent_qs.shape
    actions = actions_onehot.reshape(bs, T, -1).astype(jnp.float32)
    sa = jnp.concatenate([states.astype(jnp.float32), actions], axis=2)
    sa = sa.reshape(-1, sa.shape[-1])
    q = agent_qs.reshape(-1, 1, n_agents).astype(jnp.float32)

    rnd = (lambda x: x.astype(jnp.bfloat16).astype(jnp.float32)) if cast_bf16 else (lambda x: x)
    sa = rnd(sa)

    # hyper_w_1 stored as (A, SA, E); flat output index = a*E + e (matches torch .view)
    w1_flat = jnp.abs(jnp.einsum('bs,ase->bae', sa, rnd(w1)) + rnd(bw1))      # (B, A, E)
    b1 = (sa @ rnd(wb1) + rnd(bb1)).reshape(-1, 1, embed_dim)
    hidden = jnp.einsum('bxa,bae->bxe', q, w1_flat) + b1
    hidden = jnp.where(hidden > 0, hidden, jnp.exp(jnp.minimum(hidden, 0.0)) - 1.0)
    w_final = jnp.abs(sa @ rnd(wf) + rnd(bf)).reshape(-1, embed_dim, 1)
    v = (jnp.maximum(sa @ rnd(wv1) + rnd(bv1), 0.0) @ wv2 + bv2).reshape(-1, 1, 1)
    y = jnp.einsum('bxe,beo->bxo', hidden, w_final) + v
    return y.reshape(bs, -1, 1)


def init_params(key, sa_dim, n_agents, embed_dim):
    ks = jax.random.split(key, 10)
    scale = 0.1
    w1 = scale * jax.random.normal(ks[0], (n_agents, sa_dim, embed_dim), jnp.float32)
    bw1 = scale * jax.random.normal(ks[1], (n_agents, embed_dim), jnp.float32)
    wb1 = scale * jax.random.normal(ks[2], (sa_dim, embed_dim), jnp.float32)
    bb1 = scale * jax.random.normal(ks[3], (1, embed_dim), jnp.float32)
    wf = scale * jax.random.normal(ks[4], (sa_dim, embed_dim), jnp.float32)
    bf = scale * jax.random.normal(ks[5], (1, embed_dim), jnp.float32)
    wv1 = scale * jax.random.normal(ks[6], (sa_dim, embed_dim), jnp.float32)
    bv1 = scale * jax.random.normal(ks[7], (1, embed_dim), jnp.float32)
    wv2 = scale * jax.random.normal(ks[8], (embed_dim, 1), jnp.float32)
    bv2 = scale * jax.random.normal(ks[9], (1, 1), jnp.float32)
    return (w1, bw1, wb1, bb1, wf, bf, wv1, bv1, wv2, bv2)


def _check(q_tot, agent_qs, states, actions_onehot, params, embed_dim):
    ref_bf16 = qmix_reference(agent_qs, states, actions_onehot, params,
                              embed_dim=embed_dim, cast_bf16=True)
    ref_f32 = qmix_reference(agent_qs, states, actions_onehot, params,
                             embed_dim=embed_dim, cast_bf16=False)
    assert jnp.all(jnp.isfinite(q_tot))
    # Tight check against the bf16-rounded reference (same rounding as the kernel).
    assert jnp.allclose(q_tot, ref_bf16, atol=2e-3, rtol=2e-3), \
        f"bf16-ref max err {jnp.max(jnp.abs(q_tot - ref_bf16))}"
    # Loose sanity check against the pure-f32 reference (bf16 rounding of the
    # hypernet inputs bounds how tight this can be).
    assert jnp.allclose(q_tot, ref_f32, atol=2.5e-1, rtol=1e-1), \
        f"f32-ref max err {jnp.max(jnp.abs(q_tot - ref_f32))}"


if __name__ == "__main__":
    # Synthetic "args": n_agents=4, n_actions=6, state_shape=(32,), mixing_embed_dim=32
    n_agents, n_actions = 4, 6
    state_dim, embed_dim = 32, 32
    sa_dim = state_dim + n_actions * n_agents   # 56

    key = jax.random.PRNGKey(0)
    k_q, k_s, k_a, k_p, k_q2, k_s2, k_a2 = jax.random.split(key, 7)
    params = init_params(k_p, sa_dim, n_agents, embed_dim)

    # --- test 1: small batch, default tile_b (single grid step, padding discarded) ---
    bs, T = 2, 8
    agent_qs = jax.random.normal(k_q, (bs, T, n_agents), jnp.float32)
    states = jax.random.normal(k_s, (bs, T, state_dim), jnp.float32)
    act_idx = jax.random.randint(k_a, (bs, T, n_agents), 0, n_actions)
    actions_onehot = jax.nn.one_hot(act_idx, n_actions, dtype=jnp.float32)

    q_tot = qmix_forward(agent_qs, states, actions_onehot, params, embed_dim=embed_dim)
    q_tot = jax.block_until_ready(q_tot)
    assert q_tot.shape == (bs, T, 1), q_tot.shape
    _check(q_tot, agent_qs, states, actions_onehot, params, embed_dim)

    # --- test 2: multi-tile grid (grid=3) + batch-padding discard path ---
    bs2, T2 = 3, 100                                   # B=300 -> B_pad=384 at tile_b=128
    agent_qs2 = jax.random.normal(k_q2, (bs2, T2, n_agents), jnp.float32)
    states2 = jax.random.normal(k_s2, (bs2, T2, state_dim), jnp.float32)
    act_idx2 = jax.random.randint(k_a2, (bs2, T2, n_agents), 0, n_actions)
    actions_onehot2 = jax.nn.one_hot(act_idx2, n_actions, dtype=jnp.float32)

    q_tot2 = qmix_forward(agent_qs2, states2, actions_onehot2, params,
                          embed_dim=embed_dim, tile_b=128)
    q_tot2 = jax.block_until_ready(q_tot2)
    assert q_tot2.shape == (bs2, T2, 1), q_tot2.shape
    _check(q_tot2, agent_qs2, states2, actions_onehot2, params, embed_dim)

    print("KERNEL_OK")
</pallas_src>

<mosaic_0001>
module attributes {stable_mosaic.version = 11 : i64} {
  func.func @qmix_kernel(%arg0: i32, %arg1: memref<1024x57xbf16, #tpu.memory_space<vmem>>, %arg2: memref<4x1024xf32, #tpu.memory_space<vmem>>, %arg3: memref<224x57xbf16, #tpu.memory_space<vmem>>, %arg4: memref<32x1xf32, #tpu.memory_space<vmem>>, %arg5: memref<1x1xf32, #tpu.memory_space<vmem>>, %arg6: memref<1x1024xf32, #tpu.memory_space<vmem>>) attributes {dimension_semantics = [#tpu.dimension_semantics<parallel>], iteration_bounds = array<i64: 1>, scalar_prefetch = 0 : i64, scratch_operands = 0 : i64, tpu.core_type = #tpu.core_type<tc>, window_params = [{transform_indices = @transform_0, window_bounds = array<i64: 1024, 57>}, {transform_indices = @transform_1, window_bounds = array<i64: 4, 1024>}, {pipeline_mode = #tpu.pipeline_mode<synchronous>, transform_indices = @transform_2, window_bounds = array<i64: 224, 57>}, {pipeline_mode = #tpu.pipeline_mode<synchronous>, transform_indices = @transform_3, window_bounds = array<i64: 32, 1>}, {pipeline_mode = #tpu.pipeline_mode<synchronous>, transform_indices = @transform_4, window_bounds = array<i64: 1, 1>}, {transform_indices = @transform_5, window_bounds = array<i64: 1, 1024>}]} {
    %c0 = arith.constant 0 : index
    %c0_0 = arith.constant 0 : index
    %0 = vector.load %arg3[%c0, %c0_0] : memref<224x57xbf16, #tpu.memory_space<vmem>>, vector<224x57xbf16>
    %c0_1 = arith.constant 0 : index
    %c0_2 = arith.constant 0 : index
    %1 = vector.load %arg1[%c0_1, %c0_2] : memref<1024x57xbf16, #tpu.memory_space<vmem>>, vector<1024x57xbf16>
    %cst = arith.constant dense<0.000000e+00> : vector<224x1024xf32>
    %2 = tpu.matmul %0, %1, %cst {dimension_numbers = #tpu.dot_dimension_numbers<[1], [1], [0], [0], [0, 0, 1, 0], [], []>} : vector<224x57xbf16>, vector<1024x57xbf16>, vector<224x1024xf32> -> vector<224x1024xf32>
    %c0_3 = arith.constant 0 : index
    %c0_4 = arith.constant 0 : index
    %3 = vector.load %arg2[%c0_3, %c0_4] : memref<4x1024xf32, #tpu.memory_space<vmem>>, vector<4x1024xf32>
    %4 = vector.extract_strided_slice %2 {offsets = [128, 0], sizes = [32, 1024], strides = [1, 1]} : vector<224x1024xf32> to vector<32x1024xf32>
    %5 = vector.extract_strided_slice %3 {offsets = [0, 0], sizes = [1, 1024], strides = [1, 1]} : vector<4x1024xf32> to vector<1x1024xf32>
    %6 = vector.extract_strided_slice %2 {offsets = [0, 0], sizes = [32, 1024], strides = [1, 1]} : vector<224x1024xf32> to vector<32x1024xf32>
    %7 = math.absf %6 : vector<32x1024xf32>
    %8 = vector.broadcast %5 : vector<1x1024xf32> to vector<32x1024xf32>
    %9 = arith.mulf %8, %7 : vector<32x1024xf32>
    %10 = arith.addf %4, %9 : vector<32x1024xf32>
    %11 = vector.extract_strided_slice %3 {offsets = [1, 0], sizes = [1, 1024], strides = [1, 1]} : vector<4x1024xf32> to vector<1x1024xf32>
    %12 = vector.extract_strided_slice %2 {offsets = [32, 0], sizes = [32, 1024], strides = [1, 1]} : vector<224x1024xf32> to vector<32x1024xf32>
    %13 = math.absf %12 : vector<32x1024xf32>
    %14 = vector.broadcast %11 : vector<1x1024xf32> to vector<32x1024xf32>
    %15 = arith.mulf %14, %13 : vector<32x1024xf32>
    %16 = arith.addf %10, %15 : vector<32x1024xf32>
    %17 = vector.extract_strided_slice %3 {offsets = [2, 0], sizes = [1, 1024], strides = [1, 1]} : vector<4x1024xf32> to vector<1x1024xf32>
    %18 = vector.extract_strided_slice %2 {offsets = [64, 0], sizes = [32, 1024], strides = [1, 1]} : vector<224x1024xf32> to vector<32x1024xf32>
    %19 = math.absf %18 : vector<32x1024xf32>
    %20 = vector.broadcast %17 : vector<1x1024xf32> to vector<32x1024xf32>
    %21 = arith.mulf %20, %19 : vector<32x1024xf32>
    %22 = arith.addf %16, %21 : vector<32x1024xf32>
    %23 = vector.extract_strided_slice %3 {offsets = [3, 0], sizes = [1, 1024], strides = [1, 1]} : vector<4x1024xf32> to vector<1x1024xf32>
    %24 = vector.extract_strided_slice %2 {offsets = [96, 0], sizes = [32, 1024], strides = [1, 1]} : vector<224x1024xf32> to vector<32x1024xf32>
    %25 = math.absf %24 : vector<32x1024xf32>
    %26 = vector.broadcast %23 : vector<1x1024xf32> to vector<32x1024xf32>
    %27 = arith.mulf %26, %25 : vector<32x1024xf32>
    %28 = arith.addf %22, %27 : vector<32x1024xf32>
    %cst_5 = arith.constant 0.000000e+00 : f32
    %29 = vector.broadcast %cst_5 : f32 to vector<32x1024xf32>
    %30 = arith.cmpf ogt, %28, %29 : vector<32x1024xf32>
    %cst_6 = arith.constant 0.000000e+00 : f32
    %31 = vector.broadcast %cst_6 : f32 to vector<32x1024xf32>
    %32 = arith.minimumf %28, %31 : vector<32x1024xf32>
    %33 = math.exp %32 : vector<32x1024xf32>
    %cst_7 = arith.constant 1.000000e+00 : f32
    %34 = vector.broadcast %cst_7 : f32 to vector<32x1024xf32>
    %35 = arith.subf %33, %34 : vector<32x1024xf32>
    %36 = arith.select %30, %28, %35 : vector<32x1024xi1>, vector<32x1024xf32>
    %37 = vector.extract_strided_slice %2 {offsets = [160, 0], sizes = [32, 1024], strides = [1, 1]} : vector<224x1024xf32> to vector<32x1024xf32>
    %38 = math.absf %37 : vector<32x1024xf32>
    %39 = vector.extract_strided_slice %2 {offsets = [192, 0], sizes = [32, 1024], strides = [1, 1]} : vector<224x1024xf32> to vector<32x1024xf32>
    %cst_8 = arith.constant 0.000000e+00 : f32
    %40 = vector.broadcast %cst_8 : f32 to vector<32x1024xf32>
    %41 = arith.maximumf %39, %40 : vector<32x1024xf32>
    %42 = arith.mulf %36, %38 : vector<32x1024xf32>
    %cst_9 = arith.constant dense<0.000000e+00> : vector<1024xf32>
    %43 = vector.multi_reduction <add>, %42, %cst_9 [0] : vector<32x1024xf32> to vector<1024xf32>
    %44 = vector.shape_cast %43 : vector<1024xf32> to vector<1x1024xf32>
    %c0_10 = arith.constant 0 : index
    %c0_11 = arith.constant 0 : index
    %45 = vector.load %arg4[%c0_10, %c0_11] : memref<32x1xf32, #tpu.memory_space<vmem>>, vector<32x1xf32>
    %46 = vector.broadcast %45 : vector<32x1xf32> to vector<32x1024xf32>
    %47 = arith.mulf %41, %46 : vector<32x1024xf32>
    %cst_12 = arith.constant dense<0.000000e+00> : vector<1024xf32>
    %48 = vector.multi_reduction <add>, %47, %cst_12 [0] : vector<32x1024xf32> to vector<1024xf32>
    %49 = vector.shape_cast %48 : vector<1024xf32> to vector<1x1024xf32>
    %c0_13 = arith.constant 0 : index
    %c0_14 = arith.constant 0 : index
    %50 = vector.load %arg5[%c0_13, %c0_14] : memref<1x1xf32, #tpu.memory_space<vmem>>, vector<1x1xf32>
    %51 = vector.broadcast %50 : vector<1x1xf32> to vector<1x1024xf32>
    %52 = arith.addf %49, %51 : vector<1x1024xf32>
    %53 = arith.addf %44, %52 : vector<1x1024xf32>
    %c0_15 = arith.constant 0 : index
    %c0_16 = arith.constant 0 : index
    %54 = vector.load %arg6[%c0_15, %c0_16] : memref<1x1024xf32, #tpu.memory_space<vmem>>, vector<1x1024xf32>
    tpu.vector_store %arg6[%c0_15, %c0_16], %53 {strides = array<i32>} : memref<1x1024xf32, #tpu.memory_space<vmem>>, vector<1x1024xf32>,
    return
  }
  func.func @transform_0(%arg0: i32) -> (i32, i32) {
    %c0_i32 = arith.constant 0 : i32
    %c0_i32_0 = arith.constant 0 : i32
    return %arg0, %c0_i32 : i32, i32
  }
  func.func @transform_1(%arg0: i32) -> (i32, i32) {
    %c0_i32 = arith.constant 0 : i32
    %c0_i32_0 = arith.constant 0 : i32
    return %c0_i32, %arg0 : i32, i32
  }
  func.func @transform_2(%arg0: i32) -> (i32, i32) {
    %c0_i32 = arith.constant 0 : i32
    %c0_i32_0 = arith.constant 0 : i32
    %c0_i32_1 = arith.constant 0 : i32
    return %c0_i32, %c0_i32_0 : i32, i32
  }
  func.func @transform_3(%arg0: i32) -> (i32, i32) {
    %c0_i32 = arith.constant 0 : i32
    %c0_i32_0 = arith.constant 0 : i32
    %c0_i32_1 = arith.constant 0 : i32
    return %c0_i32, %c0_i32_0 : i32, i32
  }
  func.func @transform_4(%arg0: i32) -> (i32, i32) {
    %c0_i32 = arith.constant 0 : i32
    %c0_i32_0 = arith.constant 0 : i32
    %c0_i32_1 = arith.constant 0 : i32
    return %c0_i32, %c0_i32_0 : i32, i32
  }
  func.func @transform_5(%arg0: i32) -> (i32, i32) {
    %c0_i32 = arith.constant 0 : i32
    %c0_i32_0 = arith.constant 0 : i32
    return %c0_i32, %arg0 : i32, i32
  }
}

</mosaic_0001>

<bundles_post_ra>
// kernel: tpu_custom_call.1
= control target key start
LH: loop header
LB: loop body
LE: loop exit
PB: predicated region body
PF: predicated region fallthrough
CT: control target
= control target key end

     0   :  { %s5540_s0 = inlined_call_operand.vmem [shape: bf16[1024,57], index: 0, kind: input, shape index: {}]   ;;  %s5541_s1 = inlined_call_operand.vmem [shape: f32[4,1024], index: 1, kind: input, shape index: {}]   ;;  %s5542_s2 = inlined_call_operand.vmem [shape: bf16[224,57], index: 2, kind: input, shape index: {}]   ;;  %s5543_s3 = inlined_call_operand.vmem [shape: f32[32,1], index: 3, kind: input, shape index: {}]   ;;  %s5544_s4 = inlined_call_operand.<no memory space> [shape: f32[1,1], index: 4, kind: input, shape index: {}]   ;;  %s5545_s5 = inlined_call_operand.hbm [shape: f32[1,1024], index: 5, kind: output, shape index: {}]  }
   0x1   :  { %v10_v0 = vstv %s5544_s4 }
   0x2   :  { %11 = vst [vmem:[#allocation2] sm:$0x1] %v10_v0 }
   0x3   :  { %v3143_v1 = vld [vmem:[%s5540_s0 + $0x78] sm:$0xff]   ;;  %vm570_vm0 = vcmask 465920   ;;  %v3147_v6 = vld [vmem:[%s5540_s0 + $0x70] sm:$0xff]   ;;  %v3151_v12 = vld [vmem:[%s5540_s0 + $0x68] sm:$0xff]  }
   0x4   :  { %v3144_v2 = vld [vmem:[%s5540_s0 + $0xf8] sm:$0xff]   ;;  %3106 = vmatprep.subr.msk.bf16.mxu0 %vm570_vm0, %v3143_v1  ;;  %v3148_v8 = vld [vmem:[%s5540_s0 + $0xf0] sm:$0xff]   ;;  %v3152_v14 = vld [vmem:[%s5540_s0 + $0xe8] sm:$0xff]  }
   0x5   :  { %v3145_v3 = vld [vmem:[%s5540_s0 + $0x38] sm:$0xff]   ;;  %3114 = vmatprep.subr.msk.bf16.mxu1 %vm570_vm0, %v3144_v2  ;;  %v3149_v9 = vld [vmem:[%s5540_s0 + $0x30] sm:$0xff]   ;;  %v3153_v15 = vld [vmem:[%s5540_s0 + $0x28] sm:$0xff]  }
   0x6   :  { %v3146_v4 = vld [vmem:[%s5540_s0 + $0xb8] sm:$0xff]   ;;  %v635_v5 = vsel %vm570_vm0, %v3145_v3, 0  ;;  %v3150_v10 = vld [vmem:[%s5540_s0 + $0xb0] sm:$0xff]   ;;  %v632_v11 = vsel %vm570_vm0, %v3149_v9, 0  ;;  %v3154_v16 = vld [vmem:[%s5540_s0 + $0xa8] sm:$0xff]   ;;  %v629_v17 = vsel %vm570_vm0, %v3153_v15, 0 }
   0x7   :  { %2931 = vmatpush3.bf16.xpose.msra.mxu0 %v635_v5  ;;  %v683_v7 = vsel %vm570_vm0, %v3146_v4, 0  ;;  %v680_v13 = vsel %vm570_vm0, %v3150_v10, 0  ;;  %v3155_v18 = vld [vmem:[%s5540_s0 + $0x60] sm:$0xff]   ;;  %v677_v19 = vsel %vm570_vm0, %v3154_v16, 0  ;;  %v3159_v24 = vld [vmem:[%s5540_s0 + $0x58] sm:$0xff]   ;;  %v3163_v31 = vld [vmem:[%s5540_s0 + $0x50] sm:$0xff]  }
   0x8   :  { %2975 = vmatpush3.bf16.xpose.msra.mxu1 %v683_v7  ;;  %3107 = vmatprep.subr.msk.bf16.mxu0 %vm570_vm0, %v3147_v6  ;;  %v3156_v20 = vld [vmem:[%s5540_s0 + $0xe0] sm:$0xff]   ;;  %v3160_v26 = vld [vmem:[%s5540_s0 + $0xd8] sm:$0xff]   ;;  %v3164_v33 = vld [vmem:[%s5540_s0 + $0xd0] sm:$0xff]  }
   0x9   :  { %3115 = vmatprep.subr.msk.bf16.mxu1 %vm570_vm0, %v3148_v8  ;;  %v3157_v21 = vld [vmem:[%s5540_s0 + $0x20] sm:$0xff]   ;;  %v3161_v27 = vld [vmem:[%s5540_s0 + $0x18] sm:$0xff]   ;;  %v3165_v34 = vld [vmem:[%s5540_s0 + $0x10] sm:$0xff]  }
   0xa   :  { %v3158_v22 = vld [vmem:[%s5540_s0 + $0xa0] sm:$0xff]   ;;  %v626_v23 = vsel %vm570_vm0, %v3157_v21, 0  ;;  %v3162_v28 = vld [vmem:[%s5540_s0 + $0x98] sm:$0xff]   ;;  %v623_v30 = vsel %vm570_vm0, %v3161_v27, 0  ;;  %v3166_v35 = vld [vmem:[%s5540_s0 + $0x90] sm:$0xff]   ;;  %v620_v36 = vsel %vm570_vm0, %v3165_v34, 0 }
   0xb   :  { %v674_v25 = vsel %vm570_vm0, %v3158_v22, 0  ;;  %v3426_v29 = vld [vmem:[%s5542_s2] sm:$0xff]   ;;  %v671_v32 = vsel %vm570_vm0, %v3162_v28, 0  ;;  %v3167_v37 = vld [vmem:[%s5540_s0 + $0x48] sm:$0xff]   ;;  %v668_v38 = vsel %vm570_vm0, %v3166_v35, 0  ;;  %v3176_v49 = vld [vmem:[%s5540_s0 + $0x178] sm:$0xff]  }
   0xc   :  { %2946 = vmatprep.mubr.msk.bf16.mxu0 %vm570_vm0, %v3426_v29  ;;  %2990 = vmatprep.mubr.msk.bf16.mxu1 %vm570_vm0, %v3426_v29  ;;  %v3168_v39 = vld [vmem:[%s5540_s0 + $0xc8] sm:$0xff]   ;;  %v3171_v43 = vld [vmem:[%s5540_s0 + $0x40] sm:$0xff]   ;;  %v3177_v51 = vld [vmem:[%s5540_s0 + $0x1f8] sm:$0xff]  }
   0xd   :  { %v3169_v40 = vld [vmem:[%s5540_s0 + $0x8] sm:$0xff]   ;;  %v3172_v45 = vld [vmem:[%s5540_s0 + $0xc0] sm:$0xff]   ;;  %v3178_v52 = vld [vmem:[%s5540_s0 + $0x138] sm:$0xff]  }
   0xe   :  { %v3170_v41 = vld [vmem:[%s5540_s0 + $0x88] sm:$0xff]   ;;  %v617_v42 = vsel %vm570_vm0, %v3169_v40, 0  ;;  %v3173_v46 = vld [vmem:[%s5540_s0] sm:$0xff]   ;;  %v3179_v53 = vld [vmem:[%s5540_s0 + $0x1b8] sm:$0xff]   ;;  %v731_v54 = vsel %vm570_vm0, %v3178_v52, 0 }
   0xf   :  { %2933 = vmatpush3.bf16.xpose.msra.mxu0 %v632_v11  ;;  %v665_v44 = vsel %vm570_vm0, %v3170_v41, 0  ;;  %v3174_v47 = vld [vmem:[%s5540_s0 + $0x80] sm:$0xff]   ;;  %v614_v48 = vsel %vm570_vm0, %v3173_v46, 0  ;;  %v3500_v55 = vld [vmem:[%s5542_s2 + $0x8] sm:$0xff]   ;;  %v779_v56 = vsel %vm570_vm0, %v3179_v53, 0  ;;  %v3181_v57 = vld [vmem:[%s5540_s0 + $0x170] sm:$0xff]  }
  0x10   :  { %2977 = vmatpush3.bf16.xpose.msra.mxu1 %v680_v13  ;;  %3108 = vmatprep.subr.msk.bf16.mxu0 %vm570_vm0, %v3151_v12  ;;  %v662_v50 = vsel %vm570_vm0, %v3174_v47, 0  ;;  %v3182_v58 = vld [vmem:[%s5540_s0 + $0x1f0] sm:$0xff]   ;;  %v3187_v63 = vld [vmem:[%s5540_s0 + $0x168] sm:$0xff]  }
  0x11   :  { %3116 = vmatprep.subr.msk.bf16.mxu1 %vm570_vm0, %v3152_v14  ;;  %v3184_v59 = vld [vmem:[%s5540_s0 + $0x130] sm:$0xff]   ;;  %v3188_v1 = vld [vmem:[%s5540_s0 + $0x1e8] sm:$0xff]  }
  0x12   :  { %v3185_v60 = vld [vmem:[%s5540_s0 + $0x1b0] sm:$0xff]   ;;  %v728_v62 = vsel %vm570_vm0, %v3184_v59, 0 }
  0x13   :  { %v3528_v61 = vld [vmem:[%s5542_s2 + $0x10] sm:$0xff]   ;;  %v776_v0 = vsel %vm570_vm0, %v3185_v60, 0 }
  0x17   :  { %2935 = vmatpush3.bf16.xpose.msra.mxu0 %v629_v17 }
  0x18   :  { %2979 = vmatpush3.bf16.xpose.msra.mxu1 %v677_v19  ;;  %3109 = vmatprep.subr.msk.bf16.mxu0 %vm570_vm0, %v3155_v18 }
  0x19   :  { %3117 = vmatprep.subr.msk.bf16.mxu1 %vm570_vm0, %v3156_v20 }
  0x1f   :  { %2937 = vmatpush3.bf16.xpose.msra.mxu0 %v626_v23 }
  0x20   :  { %2981 = vmatpush3.bf16.xpose.msra.mxu1 %v674_v25  ;;  %3110 = vmatprep.subr.msk.bf16.mxu0 %vm570_vm0, %v3159_v24 }
  0x21   :  { %3118 = vmatprep.subr.msk.bf16.mxu1 %vm570_vm0, %v3160_v26 }
  0x27   :  { %2939 = vmatpush3.bf16.xpose.msra.mxu0 %v623_v30 }
  0x28   :  { %2983 = vmatpush3.bf16.xpose.msra.mxu1 %v671_v32  ;;  %3111 = vmatprep.subr.msk.bf16.mxu0 %vm570_vm0, %v3163_v31 }
  0x29   :  { %3119 = vmatprep.subr.msk.bf16.mxu1 %vm570_vm0, %v3164_v33 }
  0x2f   :  { %2941 = vmatpush3.bf16.xpose.msra.mxu0 %v620_v36 }
  0x30   :  { %2985 = vmatpush3.bf16.xpose.msra.mxu1 %v668_v38  ;;  %3112 = vmatprep.subr.msk.bf16.mxu0 %vm570_vm0, %v3167_v37 }
  0x31   :  { %3120 = vmatprep.subr.msk.bf16.mxu1 %vm570_vm0, %v3168_v39 }
  0x37   :  { %2943 = vmatpush3.bf16.xpose.msra.mxu0 %v617_v42 }
  0x38   :  { %2987 = vmatpush3.bf16.xpose.msra.mxu1 %v665_v44  ;;  %3113 = vmatprep.subr.msk.bf16.mxu0 %vm570_vm0, %v3171_v43 }
  0x39   :  { %3121 = vmatprep.subr.msk.bf16.mxu1 %vm570_vm0, %v3172_v45 }
  0x3f   :  { %2945 = vmatpush3.bf16.xpose.msra.mxu0 %v614_v48 }
  0x40   :  { %2989 = vmatpush3.bf16.xpose.msra.mxu1 %v662_v50  ;;  %3122 = vmatprep.subr.msk.bf16.mxu0 %vm570_vm0, %v3176_v49 }
  0x41   :  { %3130 = vmatprep.subr.msk.bf16.mxu1 %vm570_vm0, %v3177_v51 }
  0x46   :  { %2947 = vmatmul.mubr.msk.bf16.vlgmr.msra.gmra.mxu0 %vm570_vm0, %v3426_v29 }
  0x47   :  { %2991 = vmatmul.mubr.msk.bf16.vlgmr.msra.gmra.mxu1 %vm570_vm0, %v3426_v29  ;;  %3019 = vmatpush3.bf16.xpose.msra.mxu0 %v731_v54 }
  0x48   :  { %3063 = vmatpush3.bf16.xpose.msra.mxu1 %v779_v56  ;;  %2948 = vmatprep.mubr.msk.bf16.mxu0 %vm570_vm0, %v3500_v55 }
  0x49   :  { %2992 = vmatprep.mubr.msk.bf16.mxu1 %vm570_vm0, %v3500_v55  ;;  %3123 = vmatprep.subr.msk.bf16.mxu0 %vm570_vm0, %v3181_v57 }
  0x4a   :  { %3131 = vmatprep.subr.msk.bf16.mxu1 %vm570_vm0, %v3182_v58 }
  0x4e   :  { %2949 = vmatmul.mubr.msk.bf16.gmra.mxu0 %vm570_vm0, %v3500_v55 }
  0x4f   :  { %2993 = vmatmul.mubr.msk.bf16.gmra.mxu1 %vm570_vm0, %v3500_v55  ;;  %2950 = vmatprep.mubr.msk.bf16.mxu0 %vm570_vm0, %v3528_v61 }
  0x50   :  { %2994 = vmatprep.mubr.msk.bf16.mxu1 %vm570_vm0, %v3528_v61  ;;  %3021 = vmatpush3.bf16.xpose.msra.mxu0 %v728_v62 }
  0x51   :  { %12 = vsyncpa [#allocation4], 0  ;;  %3065 = vmatpush3.bf16.xpose.msra.mxu1 %v776_v0  ;;  %3124 = vmatprep.subr.msk.bf16.mxu0 %vm570_vm0, %v3187_v63  ;;  %v3189_v2 = vld [vmem:[%s5540_s0 + $0x128] sm:$0xff]   ;;  %v3557_v4 = vld [vmem:[%s5542_s2 + $0x18] sm:$0xff]   ;;  %v3309_v26 = vmov 0  }
  0x52   :  { %3132 = vmatprep.subr.msk.bf16.mxu1 %vm570_vm0, %v3188_v1  ;;  %v3190_v3 = vld [vmem:[%s5540_s0 + $0x1a8] sm:$0xff]   ;;  %v725_v5 = vsel %vm570_vm0, %v3189_v2, 0  ;;  %v3193_v6 = vld [vmem:[%s5540_s0 + $0x160] sm:$0xff]   ;;  %v3199_v13 = vld [vmem:[%s5540_s0 + $0x158] sm:$0xff]   ;;  %3141 = vset.pattern.permute.xlu0 %v3309_v26 }
  0x53   :  { %v773_v7 = vsel %vm570_vm0, %v3190_v3, 0  ;;  %v3194_v8 = vld [vmem:[%s5540_s0 + $0x1e0] sm:$0xff]   ;;  %v3200_v15 = vld [vmem:[%s5540_s0 + $0x1d8] sm:$0xff]   ;;  %v3615_v18 = vld [vmem:[%s5542_s2 + $0x28] sm:$0xff]   ;;  %3142 = vset.pattern.permute.xlu1 %v3309_v26 }
  0x54   :  { %v3195_v9 = vld [vmem:[%s5540_s0 + $0x120] sm:$0xff]   ;;  %v3201_v16 = vld [vmem:[%s5540_s0 + $0x118] sm:$0xff]   ;;  %v3204_v20 = vld [vmem:[%s5540_s0 + $0x150] sm:$0xff]  }
  0x55   :  { %v3196_v10 = vld [vmem:[%s5540_s0 + $0x1a0] sm:$0xff]   ;;  %v722_v12 = vsel %vm570_vm0, %v3195_v9, 0  ;;  %v3202_v17 = vld [vmem:[%s5540_s0 + $0x198] sm:$0xff]   ;;  %v719_v19 = vsel %vm570_vm0, %v3201_v16, 0  ;;  %v3205_v22 = vld [vmem:[%s5540_s0 + $0x1d0] sm:$0xff]  }
  0x56   :  { %2951 = vmatmul.mubr.msk.bf16.gmra.mxu0 %vm570_vm0, %v3528_v61  ;;  %v3586_v11 = vld [vmem:[%s5542_s2 + $0x20] sm:$0xff]   ;;  %v770_v14 = vsel %vm570_vm0, %v3196_v10, 0  ;;  %v767_v21 = vsel %vm570_vm0, %v3202_v17, 0  ;;  %v3207_v24 = vld [vmem:[%s5540_s0 + $0x110] sm:$0xff]   ;;  %v3210_v30 = vld [vmem:[%s5540_s0 + $0x148] sm:$0xff]  }
  0x57   :  { %2995 = vmatmul.mubr.msk.bf16.gmra.mxu1 %vm570_vm0, %v3528_v61  ;;  %2952 = vmatprep.mubr.msk.bf16.mxu0 %vm570_vm0, %v3557_v4  ;;  %v2537_v23 = vld [vmem:[%s5543_s3] sm:$0xff]  ;;  %v3208_v25 = vld [vmem:[%s5540_s0 + $0x190] sm:$0xff]   ;;  %v716_v28 = vsel %vm570_vm0, %v3207_v24, 0  ;;  %v3211_v32 = vld [vmem:[%s5540_s0 + $0x1c8] sm:$0xff]  }
  0x58   :  { %2996 = vmatprep.mubr.msk.bf16.mxu1 %vm570_vm0, %v3557_v4  ;;  %3023 = vmatpush3.bf16.xpose.msra.mxu0 %v725_v5  ;;  %v3647_v27 = vld [vmem:[%s5542_s2 + $0x30] sm:$0xff]   ;;  %v764_v31 = vsel %vm570_vm0, %v3208_v25, 0  ;;  %v2538_v33 = vld [vmem:[%s5543_s3 + $0x8] sm:$0xff]  ;;  %v3682_v37 = vld [vmem:[%s5542_s2 + $0x38] sm:$0xff]  }
  0x59   :  { %3067 = vmatpush3.bf16.xpose.msra.mxu1 %v773_v7  ;;  %3125 = vmatprep.subr.msk.bf16.mxu0 %vm570_vm0, %v3193_v6  ;;  %v2539_v34 = vld [vmem:[%s5543_s3 + $0x10] sm:$0xff]  ;;  %v3212_v35 = vld [vmem:[%s5540_s0 + $0x108] sm:$0xff]   ;;  %v3216_v39 = vld [vmem:[%s5540_s0 + $0x140] sm:$0xff]   ;;  %v1537_v6 = vlaneseq }
  0x5a   :  { %3133 = vmatprep.subr.msk.bf16.mxu1 %vm570_vm0, %v3194_v8  ;;  %2543 = vperm.xlu0 %3141, %v2537_v23   ;;  %v3213_v36 = vld [vmem:[%s5540_s0 + $0x188] sm:$0xff]   ;;  %v713_v38 = vsel %vm570_vm0, %v3212_v35, 0  ;;  %v3217_v41 = vld [vmem:[%s5540_s0 + $0x1c0] sm:$0xff]   ;;  %v2540_v42 = vld [vmem:[%s5543_s3 + $0x18] sm:$0xff] }
  0x5b   :  { %2553 = vperm.xlu1 %3142, %v2539_v34   ;;  %v761_v40 = vsel %vm570_vm0, %v3213_v36, 0  ;;  %v3218_v43 = vld [vmem:[%s5540_s0 + $0x100] sm:$0xff]   ;;  %v3729_v48 = vld [vmem:[%s5542_s2 + $0x48] sm:$0xff]   ;;  %v3742_v50 = vld [vmem:[%s5542_s2 + $0x50] sm:$0xff]   ;;  %v3943_v10 = vshrl.u32 %v1537_v6, 7 }
  0x5c   :  { %v3219_v44 = vld [vmem:[%s5540_s0 + $0x180] sm:$0xff]   ;;  %v710_v46 = vsel %vm570_vm0, %v3218_v43, 0  ;;  %v3755_v51 = vld [vmem:[%s5542_s2 + $0x58] sm:$0xff]   ;;  %v3781_v53 = vld [vmem:[%s5542_s2 + $0x68] sm:$0xff]  }
  0x5d   :  { %v3714_v45 = vld [vmem:[%s5542_s2 + $0x40] sm:$0xff]   ;;  %v758_v47 = vsel %vm570_vm0, %v3219_v44, 0  ;;  %5596 = vst [vmem:[#allocation6_spill] sm:$0xff] %v3943_v10  ;;  %v3958_v16 = vsub.s32 0, %v3943_v10  ;;  %v3988_v25 = vsub.s32 2, %v3943_v10  ;;  %v4025_v43 = vsub.s32 7, %v3943_v10 }
  0x5e   :  { %2953 = vmatmul.mubr.msk.bf16.gmra.mxu0 %vm570_vm0, %v3557_v4  ;;  %2548 = vperm.xlu0 %3141, %v2538_v33   ;;  %v2665_v49 = vld [vmem:[#allocation2] sm:$0x1] }
  0x5f   :  { %2997 = vmatmul.mubr.msk.bf16.gmra.mxu1 %vm570_vm0, %v3557_v4  ;;  %2954 = vmatprep.mubr.msk.bf16.mxu0 %vm570_vm0, %v3586_v11  ;;  %v3768_v52 = vld [vmem:[%s5542_s2 + $0x60] sm:$0xff]   ;;  %5597 = vst [vmem:[#allocation7_spill] sm:$0xff] %v3958_v16  ;;  %5601 = vst [vmem:[#allocation11_spill] sm:$0xff] %v3988_v25 }
  0x60   :  { %2998 = vmatprep.mubr.msk.bf16.mxu1 %vm570_vm0, %v3586_v11  ;;  %3025 = vmatpush3.bf16.xpose.msra.mxu0 %v722_v12  ;;  %v3963_v17 = vld [vmem:[%s5541_s1] sm:$0xff]  ;;  %5604 = vst [vmem:[#allocation14_spill] sm:$0xff] %v4025_v43 }
  0x61   :  { %3069 = vmatpush3.bf16.xpose.msra.mxu1 %v770_v14  ;;  %3126 = vmatprep.subr.msk.bf16.mxu0 %vm570_vm0, %v3199_v13 }
  0x62   :  { %3134 = vmatprep.subr.msk.bf16.mxu1 %vm570_vm0, %v3200_v15  ;;  %2558 = vperm.xlu1 %3142, %v2540_v42  }
  0x63   :  { %2668 = vperm.xlu0 %3141, %v2665_v49  }
  0x66   :  { %2955 = vmatmul.mubr.msk.bf16.gmra.mxu0 %vm570_vm0, %v3586_v11 }
  0x67   :  { %2999 = vmatmul.mubr.msk.bf16.gmra.mxu1 %vm570_vm0, %v3586_v11  ;;  %2956 = vmatprep.mubr.msk.bf16.mxu0 %vm570_vm0, %v3615_v18 }
  0x68   :  { %3000 = vmatprep.mubr.msk.bf16.mxu1 %vm570_vm0, %v3615_v18  ;;  %3027 = vmatpush3.bf16.xpose.msra.mxu0 %v719_v19  ;;  %v3971_v19 = vld [vmem:[%s5541_s1 + $0x8] sm:$0xff] }
  0x69   :  { %3071 = vmatpush3.bf16.xpose.msra.mxu1 %v767_v21  ;;  %3127 = vmatprep.subr.msk.bf16.mxu0 %vm570_vm0, %v3204_v20  ;;  %v3978_v21 = vsub.s32 4, %v3943_v10 }
  0x6a   :  { %3135 = vmatprep.subr.msk.bf16.mxu1 %vm570_vm0, %v3205_v22  ;;  %v3981_v22 = vsub.s32 5, %v3943_v10 }
  0x6b   :  { %5599 = vst [vmem:[#allocation9_spill] sm:$0xff] %v3978_v21  ;;  %v1552_v33 = vrot.slane %v3971_v19, %v3978_v21 }
  0x6c   :  { %5600 = vst [vmem:[#allocation10_spill] sm:$0xff] %v3981_v22  ;;  %v1712_v35 = vrot.slane %v3963_v17, %v3981_v22 }
  0x6e   :  { %2957 = vmatmul.mubr.msk.bf16.gmra.mxu0 %vm570_vm0, %v3615_v18 }
  0x6f   :  { %3001 = vmatmul.mubr.msk.bf16.gmra.mxu1 %vm570_vm0, %v3615_v18  ;;  %2958 = vmatprep.mubr.msk.bf16.mxu0 %vm570_vm0, %v3647_v27 }
  0x70   :  { %3002 = vmatprep.mubr.msk.bf16.mxu1 %vm570_vm0, %v3647_v27  ;;  %3029 = vmatpush3.bf16.xpose.msra.mxu0 %v716_v28  ;;  %v1548_v28 = vrot.slane %v3971_v19, %v3958_v16 }
  0x71   :  { %3073 = vmatpush3.bf16.xpose.msra.mxu1 %v764_v31  ;;  %3128 = vmatprep.subr.msk.bf16.mxu0 %vm570_vm0, %v3210_v30 }
  0x72   :  { %3136 = vmatprep.subr.msk.bf16.mxu1 %vm570_vm0, %v3211_v32  ;;  %v1544_v32 = vrot.slane %v3963_v17, %v3978_v21 }
  0x74   :  { %v4041_v49 = vrot.slane %v1544_v32, %v3958_v16 }
  0x76   :  { %2959 = vmatmul.mubr.msk.bf16.gmra.mxu0 %vm570_vm0, %v3647_v27 }
  0x77   :  { %3003 = vmatmul.mubr.msk.bf16.gmra.mxu1 %vm570_vm0, %v3647_v27  ;;  %2960 = vmatprep.mubr.msk.bf16.mxu0 %vm570_vm0, %v3682_v37 }
  0x78   :  { %3004 = vmatprep.mubr.msk.bf16.mxu1 %vm570_vm0, %v3682_v37  ;;  %3031 = vmatpush3.bf16.xpose.msra.mxu0 %v713_v38  ;;  %v1720_v38 = vrot.slane %v3971_v19, %v3981_v22 }
  0x79   :  { %3075 = vmatpush3.bf16.xpose.msra.mxu1 %v761_v40  ;;  %3129 = vmatprep.subr.msk.bf16.mxu0 %vm570_vm0, %v3216_v39  ;;  %v1876_v40 = vrot.slane %v3963_v17, %v3988_v25 }
  0x7a   :  { %3137 = vmatprep.subr.msk.bf16.mxu1 %vm570_vm0, %v3217_v41  ;;  %v4020_v41 = vsub.s32 3, %v3943_v10 }
  0x7c   :  { %5603 = vst [vmem:[#allocation13_spill] sm:$0xff] %v4020_v41 }
  0x7e   :  { %2961 = vmatmul.mubr.msk.bf16.gmra.mxu0 %vm570_vm0, %v3682_v37 }
  0x7f   :  { %3005 = vmatmul.mubr.msk.bf16.gmra.mxu1 %vm570_vm0, %v3682_v37  ;;  %2962 = vmatprep.mubr.msk.bf16.mxu0 %vm570_vm0, %v3714_v45 }
  0x80   :  { %3006 = vmatprep.mubr.msk.bf16.mxu1 %vm570_vm0, %v3714_v45  ;;  %3033 = vmatpush3.bf16.xpose.msra.mxu0 %v710_v46 }
  0x81   :  { %3077 = vmatpush3.bf16.xpose.msra.mxu1 %v758_v47 }
  0x86   :  { %2963 = vmatmul.mubr.msk.bf16.gmra.mxu0 %vm570_vm0, %v3714_v45 }
  0x87   :  { %3007 = vmatmul.mubr.msk.bf16.gmra.mxu1 %vm570_vm0, %v3714_v45  ;;  %2964 = vmatprep.mubr.msk.bf16.mxu0 %vm570_vm0, %v3729_v48 }
  0x88   :  { %3008 = vmatprep.mubr.msk.bf16.mxu1 %vm570_vm0, %v3729_v48 }
  0x8e   :  { %2965 = vmatmul.mubr.msk.bf16.gmra.mxu0 %vm570_vm0, %v3729_v48 }
  0x8f   :  { %3009 = vmatmul.mubr.msk.bf16.gmra.mxu1 %vm570_vm0, %v3729_v48  ;;  %2966 = vmatprep.mubr.msk.bf16.mxu0 %vm570_vm0, %v3742_v50 }
  0x90   :  { %3010 = vmatprep.mubr.msk.bf16.mxu1 %vm570_vm0, %v3742_v50 }
  0x96   :  { %2967 = vmatmul.mubr.msk.bf16.gmra.mxu0 %vm570_vm0, %v3742_v50 }
  0x97   :  { %3011 = vmatmul.mubr.msk.bf16.gmra.mxu1 %vm570_vm0, %v3742_v50  ;;  %2968 = vmatprep.mubr.msk.bf16.mxu0 %vm570_vm0, %v3755_v51 }
  0x98   :  { %3012 = vmatprep.mubr.msk.bf16.mxu1 %vm570_vm0, %v3755_v51 }
  0x9e   :  { %2969 = vmatmul.mubr.msk.bf16.gmra.mxu0 %vm570_vm0, %v3755_v51 }
  0x9f   :  { %3013 = vmatmul.mubr.msk.bf16.gmra.mxu1 %vm570_vm0, %v3755_v51  ;;  %2970 = vmatprep.mubr.msk.bf16.mxu0 %vm570_vm0, %v3768_v52 }
  0xa0   :  { %3014 = vmatprep.mubr.msk.bf16.mxu1 %vm570_vm0, %v3768_v52 }
  0xa6   :  { %2971 = vmatmul.mubr.msk.bf16.gmra.mxu0 %vm570_vm0, %v3768_v52 }
  0xa7   :  { %3015 = vmatmul.mubr.msk.bf16.gmra.mxu1 %vm570_vm0, %v3768_v52  ;;  %2972 = vmatprep.mubr.msk.bf16.mxu0 %vm570_vm0, %v3781_v53 }
  0xa8   :  { %3016 = vmatprep.mubr.msk.bf16.mxu1 %vm570_vm0, %v3781_v53 }
  0xae   :  { %2973 = vmatmul.mubr.msk.bf16.gmra.mxu0 %vm570_vm0, %v3781_v53 }
  0xaf   :  { %3017 = vmatmul.mubr.msk.bf16.gmra.mxu1 %vm570_vm0, %v3781_v53  ;;  %3034 = vmatprep.mubr.msk.bf16.mxu0 %vm570_vm0, %v3426_v29 }
  0xb0   :  { %3078 = vmatprep.mubr.msk.bf16.mxu1 %vm570_vm0, %v3426_v29 }
  0xb6   :  { %3035 = vmatmul.mubr.msk.bf16.vlgmr.msra.gmra.mxu0 %vm570_vm0, %v3426_v29 }
  0xb7   :  { %3079 = vmatmul.mubr.msk.bf16.vlgmr.msra.gmra.mxu1 %vm570_vm0, %v3426_v29  ;;  %3036 = vmatprep.mubr.msk.bf16.mxu0 %vm570_vm0, %v3500_v55 }
  0xb8   :  { %3080 = vmatprep.mubr.msk.bf16.mxu1 %vm570_vm0, %v3500_v55 }
  0xbe   :  { %3037 = vmatmul.mubr.msk.bf16.gmra.mxu0 %vm570_vm0, %v3500_v55 }
  0xbf   :  { %3081 = vmatmul.mubr.msk.bf16.gmra.mxu1 %vm570_vm0, %v3500_v55  ;;  %3038 = vmatprep.mubr.msk.bf16.mxu0 %vm570_vm0, %v3528_v61 }
  0xc0   :  { %3082 = vmatprep.mubr.msk.bf16.mxu1 %vm570_vm0, %v3528_v61 }
  0xc6   :  { %3039 = vmatmul.mubr.msk.bf16.gmra.mxu0 %vm570_vm0, %v3528_v61 }
  0xc7   :  { %3083 = vmatmul.mubr.msk.bf16.gmra.mxu1 %vm570_vm0, %v3528_v61  ;;  %3040 = vmatprep.mubr.msk.bf16.mxu0 %vm570_vm0, %v3557_v4 }
  0xc8   :  { %3084 = vmatprep.mubr.msk.bf16.mxu1 %vm570_vm0, %v3557_v4 }
  0xce   :  { %3041 = vmatmul.mubr.msk.bf16.gmra.mxu0 %vm570_vm0, %v3557_v4 }
  0xcf   :  { %3085 = vmatmul.mubr.msk.bf16.gmra.mxu1 %vm570_vm0, %v3557_v4  ;;  %3042 = vmatprep.mubr.msk.bf16.mxu0 %vm570_vm0, %v3586_v11 }
  0xd0   :  { %3086 = vmatprep.mubr.msk.bf16.mxu1 %vm570_vm0, %v3586_v11 }
  0xd6   :  { %3043 = vmatmul.mubr.msk.bf16.gmra.mxu0 %vm570_vm0, %v3586_v11 }
  0xd7   :  { %3087 = vmatmul.mubr.msk.bf16.gmra.mxu1 %vm570_vm0, %v3586_v11  ;;  %3044 = vmatprep.mubr.msk.bf16.mxu0 %vm570_vm0, %v3615_v18 }
  0xd8   :  { %3088 = vmatprep.mubr.msk.bf16.mxu1 %vm570_vm0, %v3615_v18 }
  0xde   :  { %3045 = vmatmul.mubr.msk.bf16.gmra.mxu0 %vm570_vm0, %v3615_v18 }
  0xdf   :  { %3089 = vmatmul.mubr.msk.bf16.gmra.mxu1 %vm570_vm0, %v3615_v18  ;;  %3046 = vmatprep.mubr.msk.bf16.mxu0 %vm570_vm0, %v3647_v27  ;;  %v3966_v18 = vsub.s32 1, %v3943_v10 }
  0xe0   :  { %3090 = vmatprep.mubr.msk.bf16.mxu1 %vm570_vm0, %v3647_v27 }
  0xe1   :  { %5598 = vst [vmem:[#allocation8_spill] sm:$0xff] %v3966_v18  ;;  %v1708_v30 = vrot.slane %v3963_v17, %v3966_v18  ;;  %v1716_v34 = vrot.slane %v3971_v19, %v3966_v18 }
  0xe3   :  { %v4034_v46 = vrot.slane %v1708_v30, %v3966_v18  ;;  %v4062_v30 = vrot.slane %v1876_v40, %v3988_v25  ;;  %v2056_v40 = vrot.slane %v3971_v19, %v4025_v43 }
  0xe5   :  { %5605 = vst [vmem:[#allocation15_spill] sm:$0xff] %v4062_v30 }
  0xe6   :  { %3047 = vmatmul.mubr.msk.bf16.gmra.mxu0 %vm570_vm0, %v3647_v27 }
  0xe7   :  { %3091 = vmatmul.mubr.msk.bf16.gmra.mxu1 %vm570_vm0, %v3647_v27  ;;  %3048 = vmatprep.mubr.msk.bf16.mxu0 %vm570_vm0, %v3682_v37  ;;  %v1540_v27 = vrot.slane %v3963_v17, %v3958_v16 }
  0xe8   :  { %3092 = vmatprep.mubr.msk.bf16.mxu1 %vm570_vm0, %v3682_v37 }
  0xe9   :  { %v4028_v44 = vrot.slane %v1540_v27, %v3958_v16 }
  0xee   :  { %3049 = vmatmul.mubr.msk.bf16.gmra.mxu0 %vm570_vm0, %v3682_v37 }
  0xef   :  { %3093 = vmatmul.mubr.msk.bf16.gmra.mxu1 %vm570_vm0, %v3682_v37  ;;  %3050 = vmatprep.mubr.msk.bf16.mxu0 %vm570_vm0, %v3714_v45  ;;  %v4011_v37 = vsub.s32 6, %v3943_v10 }
  0xf0   :  { %3094 = vmatprep.mubr.msk.bf16.mxu1 %vm570_vm0, %v3714_v45 }
  0xf1   :  { %5602 = vst [vmem:[#allocation12_spill] sm:$0xff] %v4011_v37  ;;  %v1880_v6 = vrot.slane %v3963_v17, %v4011_v37  ;;  %v1888_v27 = vrot.slane %v3971_v19, %v4011_v37  ;;  %v4081_v37 = vld [vmem:[%s5541_s1 + $0x10] sm:$0xff] }
  0xf2   :  { %5608 = vst [vmem:[#allocation18_spill] sm:$0xff] %v4081_v37 }
  0xf6   :  { %3051 = vmatmul.mubr.msk.bf16.gmra.mxu0 %vm570_vm0, %v3714_v45 }
  0xf7   :  { %3095 = vmatmul.mubr.msk.bf16.gmra.mxu1 %vm570_vm0, %v3714_v45  ;;  %3052 = vmatprep.mubr.msk.bf16.mxu0 %vm570_vm0, %v3729_v48  ;;  %v4031_v45 = vrot.slane %v1548_v28, %v3958_v16  ;;  %v4059_v28 = vrot.slane %v1720_v38, %v3966_v18  ;;  %v2048_v38 = vrot.slane %v3963_v17, %v4025_v43 }
  0xf8   :  { %3096 = vmatprep.mubr.msk.bf16.mxu1 %vm570_vm0, %v3729_v48  ;;  %v4094_v43 = vrot.slane %v1880_v6, %v3988_v25 }
  0xfe   :  { %3053 = vmatmul.mubr.msk.bf16.gmra.mxu0 %vm570_vm0, %v3729_v48 }
  0xff   :  { %3097 = vmatmul.mubr.msk.bf16.gmra.mxu1 %vm570_vm0, %v3729_v48  ;;  %3054 = vmatprep.mubr.msk.bf16.mxu0 %vm570_vm0, %v3742_v50  ;;  %v1884_v48 = vrot.slane %v3971_v19, %v3988_v25 }
 0x100   :  { %3098 = vmatprep.mubr.msk.bf16.mxu1 %vm570_vm0, %v3742_v50 }
 0x106   :  { %v3879_v29 = vpop.f32.mrf.mxu0  ;;  %3055 = vmatmul.mubr.msk.bf16.gmra.mxu0 %vm570_vm0, %v3742_v50 }
 0x107   :  { %v3883_v54 = vpop.f32.mrf.mxu1  ;;  %3099 = vmatmul.mubr.msk.bf16.gmra.mxu1 %vm570_vm0, %v3742_v50  ;;  %3056 = vmatprep.mubr.msk.bf16.mxu0 %vm570_vm0, %v3755_v51  ;;  %v4044_v50 = vrot.slane %v1552_v33, %v3958_v16  ;;  %v2044_v33 = vrot.slane %v3963_v17, %v4020_v41 }
 0x108   :  { %v3889_v55 = vpop.f32.mrf.mxu0  ;;  %3100 = vmatprep.mubr.msk.bf16.mxu1 %vm570_vm0, %v3755_v51  ;;  %v1503_v10 = vand.u32 2147483647, %v3883_v54  ;;  %v4087_v54 = vrot.slane %v1884_v48, %v3988_v25 }
 0x109   :  { %v3893_v56 = vpop.f32.mrf.mxu1  ;;  %v4105_v48 = vrot.slane %v2044_v33, %v4020_v41  ;;  %v4124_v33 = vrot.slane %v2056_v40, %v4020_v41 }
 0x10a   :  { %v3895_v57 = vpop.f32.mrf.mxu0  ;;  %v1504_v30 = vand.u32 2147483647, %v3893_v56  ;;  %5609 = vst [vmem:[#allocation19_spill] sm:$0xff] %v4087_v54 }
 0x10b   :  { %v3897_v58 = vpop.f32.mrf.mxu1  ;;  %5610 = vst [vmem:[#allocation20_spill] sm:$0xff] %v4105_v48  ;;  %5613 = vst [vmem:[#allocation23_spill] sm:$0xff] %v4124_v33 }
 0x10c   :  { %v3899_v59 = vpop.f32.mrf.mxu0  ;;  %v1511_v17 = vand.u32 2147483647, %v3897_v58  ;;  %v4113_v58 = vld [vmem:[%s5541_s1 + $0x18] sm:$0xff] }
 0x10d   :  { %v3901_v60 = vpop.f32.mrf.mxu1  ;;  %5612 = vst [vmem:[#allocation22_spill] sm:$0xff] %v4113_v58 }
 0x10e   :  { %v3903_v61 = vpop.f32.mrf.mxu0  ;;  %3057 = vmatmul.mubr.msk.bf16.gmra.mxu0 %vm570_vm0, %v3755_v51  ;;  %v1512_v56 = vand.u32 2147483647, %v3901_v60  ;;  %v4121_v60 = vrot.slane %v2048_v38, %v4020_v41 }
 0x10f   :  { %v3907_v62 = vpop.f32.mrf.mxu1  ;;  %3101 = vmatmul.mubr.msk.bf16.gmra.mxu1 %vm570_vm0, %v3755_v51  ;;  %3058 = vmatprep.mubr.msk.bf16.mxu0 %vm570_vm0, %v3768_v52  ;;  %v4047_v51 = vrot.slane %v1716_v34, %v3966_v18  ;;  %v2052_v34 = vrot.slane %v3971_v19, %v4020_v41  ;;  %v1510_v19 = vand.u32 2147483647, %v3899_v59  ;;  %v1556_v59 = vrot.slane %v4081_v37, %v3958_v16 }
 0x110   :  { %v3913_v63 = vpop.f32.mrf.mxu0  ;;  %3102 = vmatprep.mubr.msk.bf16.mxu1 %vm570_vm0, %v3768_v52  ;;  %v1517_v6 = vand.u32 2147483647, %v3903_v61  ;;  %v4138_v61 = vmul.f32 %v4044_v50, %v1504_v30  ;;  %v1519_v40 = vand.u32 2147483647, %v3907_v62 }
 0x111   :  { %v3917_v0 = vpop.f32.mrf.mxu1  ;;  %v4108_v54 = vrot.slane %v2052_v34, %v4020_v41  ;;  %v4150_v33 = vmul.f32 %v4041_v49, %v1510_v19  ;;  %v4162_v62 = vrot.slane %v1556_v59, %v3958_v16 }
 0x112   :  { %v3919_v1 = vpop.f32.mrf.mxu0  ;;  %5614 = vst [vmem:[#allocation24_spill] sm:$0xff] %v4138_v61  ;;  %v1520_v30 = vand.u32 2147483647, %v3917_v0 }
 0x113   :  { %v3921_v2 = vpop.f32.mrf.mxu1  ;;  %5611 = vst [vmem:[#allocation21_spill] sm:$0xff] %v4108_v54  ;;  %v4132_v54 = vmul.f32 %v4031_v45, %v1503_v10  ;;  %5616 = vst [vmem:[#allocation26_spill] sm:$0xff] %v4150_v33 }
 0x114   :  { %v3923_v3 = vpop.f32.mrf.mxu0  ;;  %5617 = vst [vmem:[#allocation27_spill] sm:$0xff] %v4162_v62  ;;  %v1527_v19 = vand.u32 2147483647, %v3921_v2 }
 0x115   :  { %v3925_v4 = vpop.f32.mrf.mxu1  ;;  %v1526_v33 = vand.u32 2147483647, %v3923_v3 }
 0x116   :  { %v3927_v5 = vpop.f32.mrf.mxu0  ;;  %3059 = vmatmul.mubr.msk.bf16.gmra.mxu0 %vm570_vm0, %v3768_v52  ;;  %v1528_v0 = vand.u32 2147483647, %v3925_v4  ;;  %v4186_v4 = vmul.f32 %v4031_v45, %v1519_v40  ;;  %v4205_v40 = vmul.f32 %v4031_v45, %v1527_v19 }
 0x117   :  { %v3931_v7 = vpop.f32.mrf.mxu1  ;;  %3103 = vmatmul.mubr.msk.bf16.gmra.mxu1 %vm570_vm0, %v3768_v52  ;;  %3060 = vmatprep.mubr.msk.bf16.mxu0 %vm570_vm0, %v3781_v53  ;;  %v4050_v52 = vrot.slane %v1712_v35, %v3966_v18  ;;  %v1501_v35 = vand.u32 2147483647, %v3879_v29  ;;  %v1502_v18 = vand.u32 2147483647, %v3889_v55  ;;  %v1509_v29 = vand.u32 2147483647, %v3895_v57 }
 0x118   :  { %v3937_v8 = vpop.f32.mrf.mxu0  ;;  %3104 = vmatprep.mubr.msk.bf16.mxu1 %vm570_vm0, %v3781_v53  ;;  %v1673_v10 = vand.u32 2147483647, %v3927_v5  ;;  %v1675_v2 = vand.u32 2147483647, %v3931_v7  ;;  %v4196_v7 = vmul.f32 %v4044_v50, %v1520_v30  ;;  %5619 = vst [vmem:[#allocation29_spill] sm:$0xff] %v4205_v40 }
 0x119   :  { %v3941_v9 = vpop.f32.mrf.mxu1  ;;  %v4127_v34 = vmul.f32 %v4028_v44, %v1501_v35  ;;  %v4135_v48 = vmul.f32 %v4041_v49, %v1502_v18  ;;  %v4141_v38 = vmul.f32 %v4028_v44, %v1509_v29  ;;  %v4147_v35 = vmul.f32 %v4031_v45, %v1511_v17 }
 0x11a   :  { %v3945_v11 = vpop.f32.mrf.mxu0  ;;  %v1518_v18 = vand.u32 2147483647, %v3913_v63  ;;  %v4159_v29 = vmul.f32 %v4044_v50, %v1512_v56  ;;  %v1525_v17 = vand.u32 2147483647, %v3919_v1  ;;  %v4170_v63 = vmul.f32 %v4028_v44, %v1517_v6 }
 0x11b   :  { %v3947_v12 = vpop.f32.mrf.mxu1  ;;  %5615 = vst [vmem:[#allocation25_spill] sm:$0xff] %v4147_v35  ;;  %v1674_v3 = vand.u32 2147483647, %v3937_v8  ;;  %v1676_v62 = vand.u32 2147483647, %v3941_v9 }
 0x11c   :  { %v3949_v13 = vpop.f32.mrf.mxu0  ;;  %5618 = vst [vmem:[#allocation28_spill] sm:$0xff] %v4170_v63  ;;  %v1681_v5 = vand.u32 2147483647, %v3945_v11  ;;  %v1683_v16 = vand.u32 2147483647, %v3947_v12  ;;  %v4193_v59 = vmul.f32 %v4041_v49, %v1518_v18  ;;  %v4202_v1 = vmul.f32 %v4028_v44, %v1525_v17 }
 0x11d   :  { %v3951_v14 = vpop.f32.mrf.mxu1  ;;  %v1682_v8 = vand.u32 2147483647, %v3949_v13  ;;  %v4208_v11 = vmul.f32 %v4041_v49, %v1526_v33  ;;  %v4211_v12 = vmul.f32 %v4034_v46, %v1673_v10  ;;  %v4218_v13 = vmul.f32 %v4044_v50, %v1528_v0 }
 0x11e   :  { %v3953_v15 = vpop.f32.mrf.mxu0  ;;  %3061 = vmatmul.mubr.msk.bf16.gmra.mxu0 %vm570_vm0, %v3781_v53  ;;  %v1684_v18 = vand.u32 2147483647, %v3951_v14  ;;  %v4221_v44 = vmul.f32 %v4047_v51, %v1675_v2  ;;  %v4224_v45 = vmul.f32 %v4050_v52, %v1674_v3  ;;  %v4227_v49 = vmul.f32 %v4059_v28, %v1676_v62 }
 0x11f   :  { %v3973_v20 = vpop.f32.mrf.mxu1  ;;  %3105 = vmatmul.mubr.msk.bf16.gmra.mxu1 %vm570_vm0, %v3781_v53  ;;  %5620 = vst [vmem:[#allocation30_spill] sm:$0xff] %v4208_v11  ;;  %v1689_v30 = vand.u32 2147483647, %v3953_v15  ;;  %5621 = vst [vmem:[#allocation31_spill] sm:$0xff] %v4218_v13  ;;  %v4233_v14 = vmul.f32 %v4034_v46, %v1681_v5  ;;  %v4236_v15 = vmul.f32 %v4047_v51, %v1683_v16 }
 0x120   :  { %v3983_v23 = vpop.f32.mrf.mxu0  ;;  %v1691_v33 = vand.u32 2147483647, %v3973_v20  ;;  %v4243_v0 = vmul.f32 %v4050_v52, %v1682_v8  ;;  %v4251_v16 = vmul.f32 %v4059_v28, %v1684_v18 }
 0x121   :  { %v3985_v24 = vpop.f32.mrf.mxu1  ;;  %v1690_v50 = vand.u32 2147483647, %v3983_v23  ;;  %v4254_v23 = vmul.f32 %v4034_v46, %v1689_v30 }
 0x122   :  { %v3990_v26 = vpop.f32.mrf.mxu0  ;;  %v1692_v17 = vand.u32 2147483647, %v3985_v24 }
 0x123   :  { %v3998_v31 = vpop.f32.mrf.mxu1  ;;  %v1697_v62 = vand.u32 2147483647, %v3990_v26  ;;  %v4261_v26 = vmul.f32 %v4047_v51, %v1691_v33  ;;  %v4269_v30 = vmul.f32 %v4050_v52, %v1690_v50 }
 0x124   :  { %v4008_v36 = vpop.f32.mrf.mxu0  ;;  %v1699_v20 = vand.u32 2147483647, %v3998_v31 }
 0x125   :  { %v4015_v39 = vpop.f32.mrf.mxu1  ;;  %v1698_v2 = vand.u32 2147483647, %v4008_v36 }
 0x126   :  { %v4022_v42 = vpop.f32.mrf.mxu0  ;;  %v1700_v24 = vand.u32 2147483647, %v4015_v39  ;;  %v4272_v39 = vmul.f32 %v4059_v28, %v1692_v17 }
 0x127   :  { %v4036_v47 = vpop.f32.mrf.mxu1  ;;  %v1841_v5 = vand.u32 2147483647, %v4022_v42 }
 0x128   :  { %v4052_v53 = vpop.f32.mrf.mxu0  ;;  %v1843_v31 = vand.u32 2147483647, %v4036_v47  ;;  %v4279_v47 = vmul.f32 %v4034_v46, %v1697_v62  ;;  %v4291_v17 = vmul.f32 %v4059_v28, %v1700_v24 }
 0x129   :  { %v4064_v32 = vpop.f32.mrf.mxu1  ;;  %v1842_v36 = vand.u32 2147483647, %v4052_v53  ;;  %v4282_v53 = vmul.f32 %v4047_v51, %v1699_v20  ;;  %v5630_v51 = vld [vmem:[#allocation19_spill] sm:$0xff] }
 0x12a   :  { %5606 = vst [vmem:[#allocation16_spill] sm:$0xff] %v4064_v32  ;;  %v4072_v22 = vpop.f32.mrf.mxu0  ;;  %v4097_v32 = vrot.slane %v1888_v27, %v3988_v25  ;;  %5628 = vst [vmem:[#allocation34_spill] sm:$0xff] %v4291_v17  ;;  %v1947_v20 = vmul.f32 %v5630_v51, %v1843_v31 }
 0x12b   :  { %5607 = vst [vmem:[#allocation17_spill] sm:$0xff] %v4072_v22  ;;  %v4089_v22 = vpop.f32.mrf.mxu1  ;;  %5626 = vst [vmem:[#allocation32_spill] sm:$0xff] %v4282_v53 }
 0x12c   :  { %v4099_v55 = vpop.f32.mrf.mxu0  ;;  %v1851_v11 = vand.u32 2147483647, %v4089_v22 }
 0x12d   :  { %v4102_v57 = vpop.f32.mrf.mxu1  ;;  %v1850_v50 = vand.u32 2147483647, %v4099_v55 }
 0x12e   :  { %v4118_v27 = vpop.f32.mrf.mxu0 }
 0x12f   :  { %v4129_v25 = vpop.f32.mrf.mxu1  ;;  %v1857_v46 = vand.u32 2147483647, %v4118_v27 }
 0x130   :  { %v4144_v41 = vpop.f32.mrf.mxu0 }
 0x131   :  { %v4156_v61 = vpop.f32.mrf.mxu1  ;;  %v5622_v37 = vld [vmem:[#allocation16_spill] sm:$0xff]  ;;  %v1858_v27 = vand.u32 2147483647, %v4144_v41 }
 0x132   :  { %v4167_v35 = vpop.f32.mrf.mxu0  ;;  %v1844_v58 = vand.u32 2147483647, %v5622_v37  ;;  %5623 = vst [vmem:[#allocation16_spill] sm:$0xff] %v4272_v39  ;;  %v5624_v42 = vld [vmem:[#allocation17_spill] sm:$0xff]  ;;  %v4285_v37 = vmul.f32 %v4050_v52, %v1698_v2  ;;  %v1852_v39 = vand.u32 2147483647, %v4102_v57  ;;  %v4300_v52 = vmul.f32 %v4094_v43, %v1842_v36 }
 0x133   :  { %v4174_v56 = vpop.f32.mrf.mxu1  ;;  %v1849_v13 = vand.u32 2147483647, %v5624_v42  ;;  %5625 = vst [vmem:[#allocation17_spill] sm:$0xff] %v4279_v47  ;;  %v5629_v42 = vld [vmem:[#allocation15_spill] sm:$0xff]  ;;  %v1859_v2 = vand.u32 2147483647, %v4129_v25  ;;  %v4312_v57 = vmul.f32 %v5630_v51, %v1851_v11  ;;  %v4319_v36 = vmul.f32 %v4094_v43, %v1850_v50 }
 0x134   :  { %v4183_v6 = vpop.f32.mrf.mxu0  ;;  %5627 = vst [vmem:[#allocation33_spill] sm:$0xff] %v4285_v37  ;;  %v1945_v22 = vmul.f32 %v5629_v42, %v1841_v5  ;;  %v4303_v55 = vmul.f32 %v4097_v32, %v1844_v58  ;;  %v1860_v5 = vand.u32 2147483647, %v4156_v61  ;;  %v1865_v58 = vand.u32 2147483647, %v4167_v35 }
 0x135   :  { %v4190_v63 = vpop.f32.mrf.mxu1  ;;  %v4309_v24 = vmul.f32 %v5629_v42, %v1849_v13  ;;  %v1867_v25 = vand.u32 2147483647, %v4174_v56  ;;  %v1866_v17 = vand.u32 2147483647, %v4183_v6  ;;  %v4327_v11 = vmul.f32 %v4097_v32, %v1852_v39 }
 0x136   :  { %v4199_v9 = vpop.f32.mrf.mxu0  ;;  %v4330_v41 = vmul.f32 %v5629_v42, %v1857_v46  ;;  %v1868_v61 = vand.u32 2147483647, %v4190_v63  ;;  %v4337_v35 = vmul.f32 %v5630_v51, %v1859_v2  ;;  %v4345_v46 = vmul.f32 %v4094_v43, %v1858_v27 }
 0x137   :  { %v4215_v21 = vpop.f32.mrf.mxu1  ;;  %v2009_v37 = vand.u32 2147483647, %v4199_v9  ;;  %v4348_v63 = vmul.f32 %v4097_v32, %v1860_v5 }
 0x138   :  { %v4230_v10 = vpop.f32.mrf.mxu0  ;;  %5631 = vst [vmem:[#allocation15_spill] sm:$0xff] %v4337_v35  ;;  %v2011_v56 = vand.u32 2147483647, %v4215_v21  ;;  %5632 = vst [vmem:[#allocation19_spill] sm:$0xff] %v4345_v46  ;;  %v4355_v21 = vmul.f32 %v5629_v42, %v1865_v58  ;;  %v4365_v5 = vmul.f32 %v4097_v32, %v1868_v61  ;;  %v5639_v58 = vld [vmem:[#allocation21_spill] sm:$0xff] }
 0x139   :  { %v4240_v19 = vpop.f32.mrf.mxu1  ;;  %v2010_v6 = vand.u32 2147483647, %v4230_v10  ;;  %5633 = vst [vmem:[#allocation35_spill] sm:$0xff] %v4348_v63  ;;  %v4358_v10 = vmul.f32 %v5630_v51, %v1867_v25  ;;  %v5640_v25 = vld [vmem:[#allocation23_spill] sm:$0xff] }
 0x13a   :  { %v4248_v3 = vpop.f32.mrf.mxu0  ;;  %v2012_v53 = vand.u32 2147483647, %v4240_v19  ;;  %5634 = vst [vmem:[#allocation36_spill] sm:$0xff] %v4355_v21  ;;  %v4361_v19 = vmul.f32 %v4094_v43, %v1866_v17  ;;  %5637 = vst [vmem:[#allocation39_spill] sm:$0xff] %v4365_v5  ;;  %v2115_v21 = vmul.f32 %v5639_v58, %v2011_v56 }
 0x13b   :  { %v4258_v8 = vpop.f32.mrf.mxu1  ;;  %v2017_v9 = vand.u32 2147483647, %v4248_v3  ;;  %5635 = vst [vmem:[#allocation37_spill] sm:$0xff] %v4358_v10  ;;  %v5638_v3 = vld [vmem:[#allocation20_spill] sm:$0xff]  ;;  %v2114_v51 = vmul.f32 %v4121_v60, %v2010_v6 }
 0x13c   :  { %v4266_v18 = vpop.f32.mrf.mxu0  ;;  %v2019_v47 = vand.u32 2147483647, %v4258_v8  ;;  %5636 = vst [vmem:[#allocation38_spill] sm:$0xff] %v4361_v19  ;;  %v2113_v63 = vmul.f32 %v5638_v3, %v2009_v37  ;;  %v2116_v43 = vmul.f32 %v5640_v25, %v2012_v53 }
 0x13d   :  { %v4276_v33 = vpop.f32.mrf.mxu1  ;;  %v2018_v27 = vand.u32 2147483647, %v4266_v18  ;;  %v2121_v19 = vmul.f32 %v5638_v3, %v2017_v9 }
 0x13e   :  { %v4288_v40 = vpop.f32.mrf.mxu0  ;;  %v2020_v8 = vand.u32 2147483647, %v4276_v33  ;;  %v2123_v32 = vmul.f32 %v5639_v58, %v2019_v47 }
 0x13f   :  { %v4296_v62 = vpop.f32.mrf.mxu1  ;;  %v2025_v56 = vand.u32 2147483647, %v4288_v40 }
 0x140   :  { %v4306_v28 = vpop.f32.mrf.mxu0 }
 0x141   :  { %v4316_v31 = vpop.f32.mrf.mxu1 }
 0x142   :  { %v4324_v13 = vpop.f32.mrf.mxu0 }
 0x143   :  { %v4334_v50 = vpop.f32.mrf.mxu1 }
 0x144   :  { %v4342_v39 = vpop.f32.mrf.mxu0 }
 0x145   :  { %v4352_v2 = vpop.f32.mrf.mxu1 }
 0x146   :  { %v919_v46 = vpop.f32.mrf.mxu0 }
 0x147   :  { %v1641_v35 = vadd.f32 %v4127_v34, %v919_v46  ;;  %v1092_v42 = vpop.f32.mrf.mxu1  ;;  %v2122_v34 = vmul.f32 %v4121_v60, %v2018_v27  ;;  %v5641_v46 = vld [vmem:[#allocation24_spill] sm:$0xff] }
 0x148   :  { %v1643_v17 = vadd.f32 %v4132_v54, %v1092_v42  ;;  %v921_v18 = vpop.f32.mrf.mxu0  ;;  %v2124_v54 = vmul.f32 %v5640_v25, %v2020_v8 }
 0x149   :  { %v1809_v37 = vadd.f32 %v4211_v12, %v1641_v35  ;;  %v1642_v33 = vadd.f32 %v4135_v48, %v921_v18  ;;  %v1094_v61 = vpop.f32.mrf.mxu1  ;;  %v2027_v48 = vand.u32 2147483647, %v4296_v62  ;;  %v5642_v18 = vld [vmem:[#allocation25_spill] sm:$0xff] }
 0x14a   :  { %v1811_v6 = vadd.f32 %v4221_v44, %v1643_v17  ;;  %v1644_v53 = vadd.f32 %v5641_v46, %v1094_v61  ;;  %v923_v5 = vpop.f32.mrf.mxu0 }
 0x14b   :  { %v1977_v42 = vadd.f32 %v1945_v22, %v1809_v37  ;;  %v1810_v9 = vadd.f32 %v4224_v45, %v1642_v33  ;;  %v1649_v47 = vadd.f32 %v4141_v38, %v923_v5  ;;  %v1096_v12 = vpop.f32.mrf.mxu1  ;;  %v5643_v22 = vld [vmem:[#allocation26_spill] sm:$0xff]  ;;  %v2026_v5 = vand.u32 2147483647, %v4306_v28 }
 0x14c   :  { %v1979_v35 = vadd.f32 %v1947_v20, %v1811_v6  ;;  %v1812_v27 = vadd.f32 %v4227_v49, %v1644_v53  ;;  %v1651_v40 = vadd.f32 %v5642_v18, %v1096_v12  ;;  %v925_v10 = vpop.f32.mrf.mxu0  ;;  %v2035_v28 = vand.u32 2147483647, %v4334_v50  ;;  %v5644_v50 = vld [vmem:[#allocation28_spill] sm:$0xff] }
 0x14d   :  { %v4388_v44 = vadd.f32 %v2113_v63, %v1977_v42  ;;  %v1978_v17 = vadd.f32 %v4300_v52, %v1810_v9  ;;  %v1817_v8 = vadd.f32 %v4233_v14, %v1649_v47  ;;  %v1650_v37 = vadd.f32 %v5643_v22, %v925_v10  ;;  %v1098_v45 = vpop.f32.mrf.mxu1 }
 0x14e   :  { %v4393_v33 = vadd.f32 %v2115_v21, %v1979_v35  ;;  %v1980_v38 = vadd.f32 %v4303_v55, %v1812_v27  ;;  %v1819_v62 = vadd.f32 %v4236_v15, %v1651_v40  ;;  %v1652_v49 = vadd.f32 %v4159_v29, %v1098_v45  ;;  %v929_v20 = vpop.f32.mrf.mxu0 }
 0x14f   :  { %v4399_v63 = vadd.f32 %v2114_v51, %v1978_v17  ;;  %v1985_v52 = vadd.f32 %v4309_v24, %v1817_v8  ;;  %v1818_v14 = vadd.f32 %v4243_v0, %v1650_v37  ;;  %v1102_v61 = vpop.f32.mrf.mxu1  ;;  %v2028_v10 = vand.u32 2147483647, %v4316_v31 }
 0x150   :  { %v4404_v21 = vadd.f32 %v2116_v43, %v1980_v38  ;;  %v1987_v55 = vadd.f32 %v4312_v57, %v1819_v62  ;;  %v1820_v15 = vadd.f32 %v4251_v16, %v1652_v49  ;;  %v931_v6 = vpop.f32.mrf.mxu0  ;;  %v2033_v29 = vand.u32 2147483647, %v4324_v13  ;;  %v5648_v62 = vld [vmem:[#allocation19_spill] sm:$0xff] }
 0x151   :  { %v4410_v51 = vadd.f32 %v2121_v19, %v1985_v52  ;;  %v1986_v24 = vadd.f32 %v4319_v36, %v1818_v14  ;;  %v1104_v46 = vpop.f32.mrf.mxu1  ;;  %v2129_v0 = vmul.f32 %v5638_v3, %v2025_v56  ;;  %v2034_v31 = vand.u32 2147483647, %v4342_v39  ;;  %v5651_v14 = vld [vmem:[#allocation35_spill] sm:$0xff] }
 0x152   :  { %v4415_v43 = vadd.f32 %v2123_v32, %v1987_v55  ;;  %v1988_v57 = vadd.f32 %v4327_v11, %v1820_v15  ;;  %v933_v53 = vpop.f32.mrf.mxu0  ;;  %v2131_v16 = vmul.f32 %v5639_v58, %v2027_v48  ;;  %v2130_v13 = vmul.f32 %v4121_v60, %v2026_v5  ;;  %v5653_v15 = vld [vmem:[#allocation31_spill] sm:$0xff] }
 0x153   :  { %v4420_v42 = vadd.f32 %v2122_v34, %v1986_v24  ;;  %v1657_v19 = vadd.f32 %v5644_v50, %v929_v20  ;;  %v1106_v9 = vpop.f32.mrf.mxu1  ;;  %v2132_v36 = vmul.f32 %v5640_v25, %v2028_v10  ;;  %v2209_v56 = vmin.f32 %v4388_v44, 0.0  ;;  %v5652_v10 = vld [vmem:[#allocation32_spill] sm:$0xff] }
 0x154   :  { %v4425_v47 = vadd.f32 %v2124_v54, %v1988_v57  ;;  %v1659_v39 = vadd.f32 %v4186_v4, %v1102_v61  ;;  %v935_v32 = vpop.f32.mrf.mxu0  ;;  %v2137_v11 = vmul.f32 %v5638_v3, %v2033_v29  ;;  %v2139_v12 = vmul.f32 %v5639_v58, %v2035_v28 }
 0x155   :  { %v1825_v48 = vadd.f32 %v4254_v23, %v1657_v19  ;;  %v1658_v34 = vadd.f32 %v4193_v59, %v931_v6  ;;  %v1108_v35 = vpop.f32.mrf.mxu1  ;;  %v2138_v27 = vmul.f32 %v4121_v60, %v2034_v31  ;;  %v2036_v18 = vand.u32 2147483647, %v4352_v2  ;;  %v5645_v60 = vld [vmem:[#allocation15_spill] sm:$0xff]  ;;  %v5646_v2 = vld [vmem:[#allocation16_spill] sm:$0xff]  ;;  %v5655_v31 = vld [vmem:[#allocation33_spill] sm:$0xff] }
 0x156   :  { %v1827_v40 = vadd.f32 %v4261_v26, %v1659_v39  ;;  %v1660_v54 = vadd.f32 %v4196_v7, %v1104_v46  ;;  %v4436_v17 = vpop.f32.mrf.mxu0  ;;  %v2211_v4 = vmin.f32 %v4393_v33, 0.0  ;;  %v1665_v23 = vadd.f32 %v4202_v1, %v933_v53  ;;  %v5647_v26 = vld [vmem:[#allocation29_spill] sm:$0xff]  ;;  %v5654_v46 = vld [vmem:[#allocation36_spill] sm:$0xff] }
 0x157   :  { %v1993_v3 = vadd.f32 %v4330_v41, %v1825_v48  ;;  %v1826_v58 = vadd.f32 %v4269_v30, %v1658_v34  ;;  %v4442_v59 = vpop.f32.mrf.mxu1  ;;  %v2241_v8 = vmul.f32 1.442695, %v2209_v56  ;;  %v1667_v45 = vadd.f32 %v5647_v26, %v1106_v9  ;;  %v5649_v41 = vld [vmem:[#allocation17_spill] sm:$0xff]  ;;  %v5650_v30 = vld [vmem:[#allocation30_spill] sm:$0xff] }
 0x158   :  { %v1995_v22 = vadd.f32 %v5645_v60, %v1827_v40  ;;  %v1828_v37 = vadd.f32 %v5646_v2, %v1660_v54  ;;  %v4447_v7 = vpop.f32.mrf.mxu0  ;;  %v1833_v20 = vadd.f32 %v5649_v41, %v1665_v23  ;;  %v1666_v5 = vadd.f32 %v5650_v30, %v935_v32  ;;  %v5656_v19 = vld [vmem:[#allocation37_spill] sm:$0xff]  ;;  %v5657_v56 = vld [vmem:[#allocation34_spill] sm:$0xff]  ;;  %v5659_v23 = vld [vmem:[#allocation39_spill] sm:$0xff] }
 0x159   :  { %v4449_v38 = vadd.f32 %v2129_v0, %v1993_v3  ;;  %v1994_v49 = vadd.f32 %v5648_v62, %v1826_v58  ;;  %v4454_v1 = vpop.f32.mrf.mxu1  ;;  %v1835_v55 = vadd.f32 %v5652_v10, %v1667_v45  ;;  %v1668_v6 = vadd.f32 %v5653_v15, %v1108_v35  ;;  %v5658_v35 = vld [vmem:[#allocation38_spill] sm:$0xff] }
 0x15a   :  { %v4456_v52 = vadd.f32 %v2131_v16, %v1995_v22  ;;  %v1996_v61 = vadd.f32 %v5651_v14, %v1828_v37  ;;  %v4461_v29 = vpop.f32.mrf.mxu0  ;;  %v2210_v28 = vmin.f32 %v4399_v63, 0.0  ;;  %v2001_v0 = vadd.f32 %v5654_v46, %v1833_v20  ;;  %v5660_v37 = vld [vmem:[#allocation7_spill] sm:$0xff]  ;;  %v5661_v26 = vld [vmem:[#allocation22_spill] sm:$0xff]  ;;  %v5664_v14 = vld [vmem:[#allocation9_spill] sm:$0xff] }
 0x15b   :  { %v4464_v24 = vadd.f32 %v2130_v13, %v1994_v49  ;;  %v1834_v57 = vadd.f32 %v5655_v31, %v1666_v5  ;;  %v4468_v53 = vpop.f32.mrf.mxu1  ;;  %v2212_v16 = vmin.f32 %v4404_v21, 0.0  ;;  %v2003_v9 = vadd.f32 %v5656_v19, %v1835_v55  ;;  %v5663_v5 = vld [vmem:[#allocation18_spill] sm:$0xff] }
 0x15c   :  { %v4471_v50 = vadd.f32 %v2132_v36, %v1996_v61  ;;  %v1836_v39 = vadd.f32 %v5657_v56, %v1668_v6  ;;  %v4475_v32 = vpop.f32.mrf.mxu0  ;;  %v2140_v48 = vmul.f32 %v5640_v25, %v2036_v18  ;;  %v2217_v13 = vmin.f32 %v4410_v51, 0.0 }
 0x15d   :  { %v4479_v34 = vadd.f32 %v2137_v11, %v2001_v0  ;;  %v2002_v40 = vadd.f32 %v5658_v35, %v1834_v57  ;;  %v4482_v54 = vpop.f32.mrf.mxu1  ;;  %v2245_v3 = vmul.f32 1.442695, %v2211_v4  ;;  %v2219_v36 = vmin.f32 %v4415_v43, 0.0 }
 0x15e   :  { %v4485_v58 = vadd.f32 %v2139_v12, %v2003_v9  ;;  %v2004_v60 = vadd.f32 %v5659_v23, %v1836_v39  ;;  %v4488_v22 = vpop.f32.mrf.mxu0  ;;  %v2243_v2 = vmul.f32 1.442695, %v2210_v28  ;;  %v2218_v25 = vmin.f32 %v4420_v42, 0.0 }
 0x15f   :  { %v4491_v18 = vadd.f32 %v2138_v27, %v2002_v40  ;;  %v4493_v11 = vpop.f32.mrf.mxu1  ;;  %v5662_v45 = vrot.slane %v5661_v26, %v5660_v37  ;;  %v2247_v62 = vmul.f32 1.442695, %v2212_v16  ;;  %v2220_v12 = vmin.f32 %v4425_v47, 0.0  ;;  %v5669_v40 = vld [vmem:[#allocation8_spill] sm:$0xff] }
 0x160   :  { %v4502_v49 = vadd.f32 %v2140_v48, %v2004_v60  ;;  %3221 = vpow2.f32 %v2241_v8  ;;  %v4504_v41 = vpop.f32.mrf.mxu0  ;;  %v2257_v20 = vmul.f32 1.442695, %v2217_v13  ;;  %v2225_v27 = vmin.f32 %v4449_v38, 0.0 }
 0x161   :  { %v4499_v4 = vrot.slane %v5662_v45, %v5660_v37  ;;  %v4507_v30 = vpop.f32.mrf.mxu1  ;;  %v5665_v61 = vrot.slane %v5663_v5, %v5664_v14  ;;  %v5667_v55 = vrot.slane %v5661_v26, %v5664_v14  ;;  %v2261_v8 = vmul.f32 1.442695, %v2219_v36 }
 0x162   :  { %v2227_v6 = vmin.f32 %v4456_v52, 0.0  ;;  %v2226_v28 = vmin.f32 %v4464_v24, 0.0  ;;  %3223 = vpow2.f32 %v2245_v3  ;;  %v4523_v46 = vpop.f32.mrf.mxu0  ;;  %v2259_v0 = vmul.f32 1.442695, %v2218_v25 }
 0x163   :  { %v4513_v10 = vrot.slane %v5665_v61, %v5660_v37  ;;  %v4519_v15 = vrot.slane %v5667_v55, %v5660_v37  ;;  %v2228_v31 = vmin.f32 %v4471_v50, 0.0  ;;  %v2233_v57 = vmin.f32 %v4479_v34, 0.0  ;;  %v4527_v16 = vpop.f32.mrf.mxu1 }
 0x164   :  { %3225 = vpow2.f32 %v2243_v2  ;;  %v2263_v19 = vmul.f32 1.442695, %v2220_v12  ;;  %v2235_v9 = vmin.f32 %v4485_v58, 0.0  ;;  %v2234_v56 = vmin.f32 %v4491_v18, 0.0  ;;  %v4531_v39 = vpop.f32.mrf.mxu0 }
 0x165   :  { %5666 = vst [vmem:[#allocation20_spill] sm:$0xff] %v4513_v10  ;;  %5668 = vst [vmem:[#allocation21_spill] sm:$0xff] %v4519_v15  ;;  %3227 = vpow2.f32 %v2247_v62  ;;  %v2273_v48 = vmul.f32 1.442695, %v2225_v27  ;;  %v2236_v13 = vmin.f32 %v4502_v49, 0.0  ;;  %v4534_v35 = vpop.f32.mrf.mxu1  ;;  %vm2177_vm1 = vcmp.gt.f32.partialorder %v4388_v44, 0.0 }
 0x166   :  { %3229 = vpow2.f32 %v2257_v20  ;;  %v2277_v36 = vmul.f32 1.442695, %v2227_v6  ;;  %v2275_v23 = vmul.f32 1.442695, %v2226_v28  ;;  %v4538_v60 = vpop.f32.mrf.mxu0  ;;  %v2279_v25 = vmul.f32 1.442695, %v2228_v31 }
 0x167   :  { %3231 = vpow2.f32 %v2261_v8  ;;  %v2289_v45 = vmul.f32 1.442695, %v2233_v57  ;;  %v2369_v62 = vand.u32 2147483647, %v4436_v17  ;;  %v4544_v12 = vpop.f32.mrf.mxu1  ;;  %v2293_v20 = vmul.f32 1.442695, %v2235_v9 }
 0x168   :  { %3233 = vpow2.f32 %v2259_v0  ;;  %v2291_v27 = vmul.f32 1.442695, %v2234_v56  ;;  %v961_v61 = vpop.f32.mrf.mxu0  ;;  %v2295_v55 = vmul.f32 1.442695, %v2236_v13  ;;  %vm2179_vm2 = vcmp.gt.f32.partialorder %v4393_v33, 0.0  ;;  %v4569_v56 = vpop.permute.xlu0 %2543 }
 0x169   :  { %3235 = vpow2.f32 %v2263_v19  ;;  %v1134_v28 = vpop.f32.mrf.mxu1  ;;  %vm2178_vm3 = vcmp.gt.f32.partialorder %v4399_v63, 0.0  ;;  %vm2180_vm4 = vcmp.gt.f32.partialorder %v4404_v21, 0.0  ;;  %vm2185_vm5 = vcmp.gt.f32.partialorder %v4410_v51, 0.0  ;;  %5670 = vst [vmem:[#allocation23_spill] sm:$0xff] %v4569_v56 }
 0x16a   :  { %3237 = vpow2.f32 %v2273_v48  ;;  %v4554_v57 = vpop.f32.mrf.mxu0  ;;  %vm2187_vm6 = vcmp.gt.f32.partialorder %v4415_v43, 0.0  ;;  %v2402_v19 = vmax.f32 %v961_v61, 0.0  ;;  %vm2186_vm7 = vcmp.gt.f32.partialorder %v4420_v42, 0.0 }
 0x16b   :  { %3239 = vpow2.f32 %v2277_v36  ;;  %v4560_v48 = vpop.f32.mrf.mxu1  ;;  %v2404_v2 = vmax.f32 %v1134_v28, 0.0  ;;  %vm2188_vm8 = vcmp.gt.f32.partialorder %v4425_v47, 0.0  ;;  %vm2193_vm9 = vcmp.gt.f32.partialorder %v4449_v38, 0.0 }
 0x16c   :  { %3241 = vpow2.f32 %v2275_v23  ;;  %v965_v3 = vpop.f32.mrf.mxu0  ;;  %v2401_v23 = vmax.f32 %v4538_v60, 0.0  ;;  %vm2195_vm10 = vcmp.gt.f32.partialorder %v4456_v52, 0.0  ;;  %v2562_v61 = vmul.f32 %v4569_v56, %v2402_v19 }
 0x16d   :  { %3243 = vpow2.f32 %v2279_v25  ;;  %v3222_v31 = vpop.eup %3221  ;;  %v1138_v0 = vpop.f32.mrf.mxu1  ;;  %v2564_v8 = vmul.f32 %v4569_v56, %v2404_v2  ;;  %vm2194_vm11 = vcmp.gt.f32.partialorder %v4464_v24, 0.0  ;;  %vm2196_vm12 = vcmp.gt.f32.partialorder %v4471_v50, 0.0 }
 0x16e   :  { %3245 = vpow2.f32 %v2289_v45  ;;  %v2898_v17 = vadd.f32 -1.0, %v3222_v31  ;;  %v4573_v36 = vpop.f32.mrf.mxu0  ;;  %v4586_v25 = vmul.f32 %v4569_v56, %v2401_v23  ;;  %v2412_v23 = vmax.f32 %v1138_v0, 0.0 }
 0x16f   :  { %3247 = vpow2.f32 %v2293_v20  ;;  %v3224_v13 = vpop.eup %3223  ;;  %v4579_v9 = vpop.f32.mrf.mxu1  ;;  %v5673_v0 = vand.u32 2147483647, %v4447_v7  ;;  %vm2201_vm13 = vcmp.gt.f32.partialorder %v4479_v34, 0.0  ;;  %vm2203_vm14 = vcmp.gt.f32.partialorder %v4485_v58, 0.0 }
 0x170   :  { %3249 = vpow2.f32 %v2291_v27  ;;  %v2337_v20 = vsel %vm2177_vm1, %v4388_v44, %v2898_v17  ;;  %v2900_v28 = vadd.f32 -1.0, %v3224_v13  ;;  %v4588_v27 = vpop.f32.mrf.mxu0  ;;  %v2410_v13 = vmax.f32 %v965_v3, 0.0 }
 0x171   :  { %v3226_v31 = vpop.eup %3225  ;;  %3251 = vpow2.f32 %v2295_v55  ;;  %v2433_v60 = vmul.f32 %v2369_v62, %v2337_v20  ;;  %v4593_v14 = vpop.f32.mrf.mxu1  ;;  %v5671_v20 = vand.u32 2147483647, %v4442_v59  ;;  %vm2202_vm15 = vcmp.gt.f32.partialorder %v4491_v18, 0.0 }
 0x172   :  { %v3228_v45 = vpop.eup %3227  ;;  %v2899_v6 = vadd.f32 -1.0, %v3226_v31  ;;  %v2339_v55 = vsel %vm2179_vm2, %v4393_v33, %v2900_v28  ;;  %v4599_v62 = vpop.f32.mrf.mxu0  ;;  %vm2204_vm0 = vcmp.gt.f32.partialorder %v4502_v49, 0.0 }
 0x173   :  { %v3230_v44 = vpop.eup %3229  ;;  %v2901_v17 = vadd.f32 -1.0, %v3228_v45  ;;  %v2435_v19 = vmul.f32 %v5671_v20, %v2339_v55  ;;  %v4608_v45 = vpop.permute.xlu0 %2548  ;;  %v5674_v20 = vand.u32 2147483647, %v4454_v1 }
 0x174   :  { %v3232_v31 = vpop.eup %3231  ;;  %v2338_v2 = vsel %vm2178_vm3, %v4399_v63, %v2899_v6  ;;  %v2906_v15 = vadd.f32 -1.0, %v3230_v44  ;;  %5672 = vst [vmem:[#allocation24_spill] sm:$0xff] %v4608_v45  ;;  %v4610_v28 = vpop.f32.mrf.mxu1  ;;  %v2570_v63 = vmul.f32 %v4608_v45, %v2410_v13  ;;  %v5675_v13 = vand.u32 2147483647, %v4461_v29 }
 0x175   :  { %v3234_v3 = vpop.eup %3233  ;;  %v2434_v10 = vmul.f32 %v5673_v0, %v2338_v2  ;;  %v2340_v59 = vsel %vm2180_vm4, %v4404_v21, %v2901_v17  ;;  %v2908_v55 = vadd.f32 -1.0, %v3232_v31  ;;  %v4619_v6 = vpop.f32.mrf.mxu0  ;;  %v2572_v21 = vmul.f32 %v4608_v45, %v2412_v23 }
 0x176   :  { %v3236_v44 = vpop.eup %3235  ;;  %v2436_v33 = vmul.f32 %v5674_v20, %v2340_v59  ;;  %v2345_v7 = vsel %vm2185_vm5, %v4410_v51, %v2906_v15  ;;  %v2907_v2 = vadd.f32 -1.0, %v3234_v3  ;;  %v4628_v17 = vpop.f32.mrf.mxu1  ;;  %v4636_v20 = vadd.f32 %v2570_v63, %v2562_v61 }
 0x177   :  { %v3238_v31 = vpop.eup %3237  ;;  %v2441_v0 = vmul.f32 %v5675_v13, %v2345_v7  ;;  %v2347_v1 = vsel %vm2187_vm6, %v4415_v43, %v2908_v55  ;;  %v2909_v59 = vadd.f32 -1.0, %v3236_v44  ;;  %v4638_v51 = vpop.f32.mrf.mxu0  ;;  %v5676_v23 = vand.u32 2147483647, %v4468_v53 }
 0x178   :  { %v3240_v15 = vpop.eup %3239  ;;  %v2346_v29 = vsel %vm2186_vm7, %v4420_v42, %v2907_v2  ;;  %v2914_v7 = vadd.f32 -1.0, %v3238_v31  ;;  %v4646_v13 = vadd.f32 %v2572_v21, %v2564_v8  ;;  %v4648_v43 = vpop.f32.mrf.mxu1  ;;  %v5677_v63 = vand.u32 2147483647, %v4475_v32 }
 0x179   :  { %v2443_v3 = vmul.f32 %v5676_v23, %v2347_v1  ;;  %v3242_v55 = vpop.eup %3241  ;;  %v2465_v61 = vadd.f32 %v2441_v0, %v2433_v60  ;;  %v2348_v53 = vsel %vm2188_vm8, %v4425_v47, %v2909_v59  ;;  %v2916_v1 = vadd.f32 -1.0, %v3240_v15  ;;  %v4655_v23 = vpop.f32.mrf.mxu0 }
 0x17a   :  { %v2442_v44 = vmul.f32 %v5677_v63, %v2346_v29  ;;  %v3244_v42 = vpop.eup %3243  ;;  %v5678_v31 = vand.u32 2147483647, %v4482_v54  ;;  %v2353_v21 = vsel %vm2193_vm9, %v4449_v38, %v2914_v7  ;;  %v2915_v60 = vadd.f32 -1.0, %v3242_v55  ;;  %v4662_v0 = vpop.f32.mrf.mxu1 }
 0x17b   :  { %v2483_v2 = vadd.f32 %v2443_v3, %v2435_v19  ;;  %v3246_v32 = vpop.eup %3245  ;;  %v5679_v63 = vand.u32 2147483647, %v4488_v22  ;;  %v2355_v59 = vsel %vm2195_vm10, %v4456_v52, %v2916_v1  ;;  %v2917_v19 = vadd.f32 -1.0, %v3244_v42  ;;  %v4669_v15 = vpop.f32.mrf.mxu0 }
 0x17c   :  { %v2444_v8 = vmul.f32 %v5678_v31, %v2348_v53  ;;  %v2474_v29 = vadd.f32 %v2442_v44, %v2434_v10  ;;  %v3248_v54 = vpop.eup %3247  ;;  %v5680_v53 = vand.u32 2147483647, %v4493_v11  ;;  %v2354_v7 = vsel %vm2194_vm11, %v4464_v24, %v2915_v60  ;;  %v4676_v55 = vpop.f32.mrf.mxu1 }
 0x17d   :  { %v2449_v47 = vmul.f32 %v5679_v63, %v2353_v21  ;;  %v2922_v10 = vadd.f32 -1.0, %v3246_v32  ;;  %v3250_v22 = vpop.eup %3249  ;;  %v5681_v31 = vand.u32 2147483647, %v4504_v41  ;;  %v2356_v1 = vsel %vm2196_vm12, %v4471_v50, %v2917_v19  ;;  %v4683_v42 = vpop.f32.mrf.mxu0 }
 0x17e   :  { %v2492_v3 = vadd.f32 %v2444_v8, %v2436_v33  ;;  %v2451_v38 = vmul.f32 %v5680_v53, %v2355_v59  ;;  %v2924_v33 = vadd.f32 -1.0, %v3248_v54  ;;  %v3252_v11 = vpop.eup %3251  ;;  %v5682_v21 = vand.u32 2147483647, %v4507_v30  ;;  %v4690_v32 = vpop.permute.xlu1 %2553 }
 0x17f   :  { %v2466_v44 = vadd.f32 %v2465_v61, %v2449_v47  ;;  %v2450_v52 = vmul.f32 %v5681_v31, %v2354_v7  ;;  %v2361_v60 = vsel %vm2201_vm13, %v4479_v34, %v2922_v10  ;;  %v2923_v61 = vadd.f32 -1.0, %v3250_v22  ;;  %5683 = vst [vmem:[#allocation25_spill] sm:$0xff] %v4690_v32  ;;  %v4692_v41 = vpop.f32.mrf.mxu1  ;;  %v4699_v30 = vpop.f32.mrf.mxu0 }
 0x180   :  { %v2484_v8 = vadd.f32 %v2483_v2, %v2451_v38  ;;  %v2452_v24 = vmul.f32 %v5682_v21, %v2356_v1  ;;  %v5684_v50 = vand.u32 2147483647, %v4523_v46  ;;  %v2363_v2 = vsel %vm2203_vm14, %v4485_v58, %v2924_v33 }
 0x181   :  { %v2475_v63 = vadd.f32 %v2474_v29, %v2450_v52  ;;  %v2925_v59 = vadd.f32 -1.0, %v3252_v11  ;;  %v5685_v54 = vand.u32 2147483647, %v4527_v16  ;;  %v2362_v53 = vsel %vm2202_vm15, %v4491_v18, %v2923_v61  ;;  %v4709_v38 = vpop.f32.mrf.mxu1  ;;  %v4717_v22 = vpop.f32.mrf.mxu0 }
 0x182   :  { %v2457_v47 = vmul.f32 %v5684_v50, %v2361_v60  ;;  %v2493_v19 = vadd.f32 %v2492_v3, %v2452_v24  ;;  %v5686_v29 = vmax.f32 %v4554_v57, 0.0  ;;  %v5687_v58 = vand.u32 2147483647, %v4531_v39  ;;  %v4733_v60 = vpop.permute.xlu1 %2558 }
 0x183   :  { %v2459_v34 = vmul.f32 %v5685_v54, %v2363_v2  ;;  %v2364_v3 = vsel %vm2204_vm0, %v4502_v49, %v2925_v59  ;;  %v2417_v16 = vmax.f32 %v4573_v36, 0.0  ;;  %v5688_v18 = vand.u32 2147483647, %v4534_v35  ;;  %v4729_v21 = vpop.f32.mrf.mxu0  ;;  %5690 = vst [vmem:[#allocation26_spill] sm:$0xff] %v4733_v60  ;;  %v2669_v54 = vpop.permute.xlu0 %2668 }
 0x184   :  { %v2569_v46 = vmul.f32 %v4608_v45, %v5686_v29  ;;  %v2467_v7 = vadd.f32 %v2466_v44, %v2457_v47  ;;  %v2458_v10 = vmul.f32 %v5687_v58, %v2362_v53  ;;  %v2419_v52 = vmax.f32 %v4579_v9, 0.0  ;;  %v4723_v44 = vpop.f32.mrf.mxu1 }
 0x185   :  { %v2485_v31 = vadd.f32 %v2484_v8, %v2459_v34  ;;  %v2460_v57 = vmul.f32 %v5688_v18, %v2364_v3  ;;  %v2418_v1 = vmax.f32 %v4588_v27, 0.0  ;;  %v5689_v11 = vmax.f32 %v4560_v48, 0.0  ;;  %v4742_v47 = vpop.f32.mrf.mxu0 }
 0x186   :  { %v2468_v39 = vrot.slane %v2467_v7, 4  ;;  %v2476_v33 = vadd.f32 %v2475_v63, %v2458_v10  ;;  %v2420_v36 = vmax.f32 %v4593_v14, 0.0  ;;  %v2425_v9 = vmax.f32 %v4599_v62, 0.0  ;;  %v4735_v27 = vpop.f32.mrf.mxu1  ;;  %5692 = vst [vmem:[#allocation28_spill] sm:$0xff] %v4742_v47 }
 0x187   :  { %v2571_v49 = vmul.f32 %v4608_v45, %v5689_v11  ;;  %v2486_v8 = vrot.slane %v2485_v31, 4  ;;  %v2494_v24 = vadd.f32 %v2493_v19, %v2460_v57  ;;  %v2578_v35 = vmul.f32 %v4690_v32, %v2418_v1  ;;  %v4751_v10 = vpop.f32.mrf.mxu0 }
 0x188   :  { %v2477_v61 = vrot.slane %v2476_v33, 4  ;;  %v5691_v63 = vmax.f32 %v4544_v12, 0.0  ;;  %v2580_v50 = vmul.f32 %v4690_v32, %v2420_v36  ;;  %v2427_v14 = vmax.f32 %v4610_v28, 0.0  ;;  %v4747_v34 = vpop.f32.mrf.mxu1 }
 0x189   :  { %v2495_v2 = vrot.slane %v2494_v24, 4  ;;  %v2577_v59 = vmul.f32 %v4690_v32, %v2417_v16  ;;  %v2579_v62 = vmul.f32 %v4690_v32, %v2419_v52  ;;  %v2603_v19 = vadd.f32 %v4636_v20, %v2578_v35  ;;  %5693 = vst [vmem:[#allocation15_spill] sm:$0xff] %v4747_v34 }
 0x18a   :  { %v2563_v48 = vmul.f32 %v4569_v56, %v5691_v63  ;;  %v2469_v53 = vadd.f32 %v2468_v39, %v2467_v7  ;;  %v2487_v12 = vadd.f32 %v2486_v8, %v2485_v31  ;;  %v2621_v29 = vadd.f32 %v4646_v13, %v2580_v50  ;;  %v4755_v57 = vpop.f32.mrf.mxu1  ;;  %v4762_v13 = vpop.f32.mrf.mxu0  ;;  %v5695_v31 = vld [vmem:[#allocation10_spill] sm:$0xff] }
 0x18b   :  { %v2585_v58 = vmul.f32 %v4733_v60, %v2425_v9  ;;  %v2478_v28 = vadd.f32 %v2477_v61, %v2476_v33  ;;  %v2587_v3 = vmul.f32 %v4733_v60, %v2427_v14  ;;  %v2593_v16 = vadd.f32 %v2569_v46, %v4586_v25 }
 0x18c   :  { %v2611_v18 = vadd.f32 %v2571_v49, %v2563_v48  ;;  %v2426_v20 = vmax.f32 %v4619_v6, 0.0  ;;  %v2428_v52 = vmax.f32 %v4628_v17, 0.0  ;;  %v4760_v7 = vrot.slane %v2669_v54, %v5660_v37  ;;  %v4766_v36 = vpop.f32.mrf.mxu1  ;;  %v4770_v17 = vpop.f32.mrf.mxu0 }
 0x18d   :  { %v1728_v1 = vrot.slane %v5663_v5, %v5695_v31  ;;  %v2496_v39 = vadd.f32 %v2495_v2, %v2494_v24  ;;  %v2594_v33 = vadd.f32 %v2593_v16, %v2577_v59  ;;  %v2470_v25 = vrot.slane %v2469_v53, 2 }
 0x18e   :  { %5694 = vst [vmem:[#allocation16_spill] sm:$0xff] %v4760_v7  ;;  %v2612_v11 = vadd.f32 %v2611_v18, %v2579_v62  ;;  %v2488_v46 = vrot.slane %v2487_v12, 2  ;;  %v2586_v49 = vmul.f32 %v4733_v60, %v2426_v20  ;;  %v2588_v6 = vmul.f32 %v4733_v60, %v2428_v52  ;;  %v4782_v61 = vpop.f32.mrf.mxu1  ;;  %v4793_v59 = vpop.f32.mrf.mxu0 }
 0x18f   :  { %v2479_v37 = vrot.slane %v2478_v28, 2  ;;  %v4772_v8 = vadd.f32 %v2594_v33, %v2585_v58  ;;  %v5696_v24 = vrot.slane %v5663_v5, %v5669_v40  ;;  %v5697_v50 = vrot.slane %v5661_v26, %v5669_v40  ;;  %v3285_v5 = vld [vmem:[%s5541_s1 + $0x18] sm:$0xff]  ;;  %v3286_v26 = vld [vmem:[%s5541_s1 + $0x10] sm:$0xff]  ;;  %s3311_s1 = smov [#allocation3]  }
 0x190   :  { %v4774_v35 = vadd.f32 %v2612_v11, %v2587_v3  ;;  %v2604_v63 = vadd.f32 %v2603_v19, %v2586_v49  ;;  %v2622_v48 = vadd.f32 %v2621_v29, %v2588_v6  ;;  %v4791_v2 = vrot.slane %v1728_v1, %v5669_v40  ;;  %v4799_v19 = vpop.f32.mrf.mxu1  ;;  %v5700_v29 = vld [vmem:[#allocation11_spill] sm:$0xff]  ;;  %v4805_v33 = vpop.f32.mrf.mxu0  ;;  %v5701_v6 = vld [vmem:[#allocation12_spill] sm:$0xff]  ;;  %s2756_s11 = sshll.u32 %s3311_s1, 4  ;;  %s2757_s11 = int_to_ptr.vmem [resolvable:$true] %s2756_s11 }
 0x191   :  { %v4780_v9 = vrot.slane %v5696_v24, %v5669_v40  ;;  %v4788_v14 = vrot.slane %v5697_v50, %v5669_v40  ;;  %v2497_v62 = vrot.slane %v2496_v39, 2  ;;  %v1736_v54 = vrot.slane %v3285_v5, %v5695_v31  ;;  %s3287_s12 = scalar_lea.vmem %s2757_s11, 128  ;;  %p3292_p1 = scmp.lt.s32.totalorder %s2757_s11, %s2757_s11 }
 0x192   :  { %5699 = vst [vmem:[#allocation19_spill] sm:$0xff] %v4791_v2  ;;  %v1892_v58 = vrot.slane %v3286_v26, %v5700_v29  ;;  %v3310_v3 = vmov 1966171168   ;;  %v2471_v18 = vadd.f32 %v2470_v25, %v2469_v53  ;;  %v2489_v20 = vadd.f32 %v2488_v46, %v2487_v12  ;;  %v4807_v49 = vpop.f32.mrf.mxu1  ;;  %v4812_v56 = vpop.f32.mrf.mxu0  ;;  %p3288_p0 = scmp.ne.s32.totalorder %s2757_s11, %s3287_s12  ;;  %p3293_p2 = scmp.lt.s32.totalorder %s3287_s12, %s3287_s12 }
 0x193   :  { %5698 = vst [vmem:[#allocation29_spill] sm:$0xff] %v4788_v14  ;;  %v2704_v16 = vunpack.c.l.s4 %v3310_v3  ;;  %v2605_v52 = vrot.slane %v2604_v63, 4  ;;  %v2623_v1 = vrot.slane %v2622_v48, 4  ;;  %v2480_v11 = vadd.f32 %v2479_v37, %v2478_v28  ;;  %v5702_v3 = vld [vmem:[#allocation13_spill] sm:$0xff]  ;;  %v5703_v28 = vld [vmem:[#allocation14_spill] sm:$0xff] }
 0x194   :  { %v1900_v31 = vrot.slane %v3285_v5, %v5700_v29  ;;  %v1896_v24 = vrot.slane %v3286_v26, %v5701_v6  ;;  %v1904_v50 = vrot.slane %v3285_v5, %v5701_v6  ;;  %v2060_v53 = vrot.slane %v3286_v26, %v5702_v3  ;;  %v4816_v46 = vpop.f32.mrf.mxu1  ;;  %p3294_p3 = por %p3293_p2, %p3292_p1 }
 0x195   :  { %v2606_v60 = vadd.f32 %v2605_v52, %v2604_v63  ;;  %v2624_v32 = vadd.f32 %v2623_v1, %v2622_v48  ;;  %v2068_v12 = vrot.slane %v3285_v5, %v5702_v3  ;;  %v2498_v25 = vadd.f32 %v2497_v62, %v2496_v39  ;;  %v4823_v63 = vpop.f32.mrf.mxu0 }
 0x196   :  { %v2064_v37 = vrot.slane %v3286_v26, %v5703_v28  ;;  %v2072_v45 = vrot.slane %v3285_v5, %v5703_v28  ;;  %v2705_v7 = vunpack.c.0.s8 %v2704_v16  ;;  %v2472_v2 = vrot.slane %v2471_v18, 1  ;;  %v4828_v1 = vpop.f32.mrf.mxu1  ;;  %p3295_p4 = pnand %p3294_p3, %p3288_p0 }
 0x197   :  { %v2490_v14 = vrot.slane %v2489_v20, 1  ;;  %v4821_v6 = vrot.slane %v1736_v54, %v5669_v40  ;;  %v4826_v48 = vrot.slane %v1892_v58, %v5700_v29  ;;  %v2481_v52 = vrot.slane %v2480_v11, 1  ;;  %v4839_v54 = vpop.f32.mrf.mxu0 }
 0x198   :  { %v4831_v39 = vrot.slane %v1900_v31, %v5700_v29  ;;  %v4834_v62 = vrot.slane %v1896_v24, %v5700_v29  ;;  %v4837_v5 = vrot.slane %v1904_v50, %v5700_v29  ;;  %v2607_v26 = vrot.slane %v2606_v60, 2  ;;  %v5710_v29 = vld [vmem:[#allocation6_spill] sm:$0xff] }
 0x199   :  { %5704 = vst [vmem:[#allocation17_spill] sm:$0xff] %v4826_v48  ;;  %v2625_v40 = vrot.slane %v2624_v32, 2  ;;  %v4842_v16 = vrot.slane %v2060_v53, %v5702_v3  ;;  %v4845_v58 = vrot.slane %v2068_v12, %v5702_v3  ;;  %v2499_v28 = vrot.slane %v2498_v25, 1  ;;  %v4847_v48 = vpop.f32.mrf.mxu1 }
 0x19a   :  { %5705 = vst [vmem:[#allocation30_spill] sm:$0xff] %v4834_v62  ;;  %5706 = vst [vmem:[#allocation35_spill] sm:$0xff] %v4837_v5  ;;  %v4850_v31 = vrot.slane %v2064_v37, %v5702_v3  ;;  %v4853_v24 = vrot.slane %v2072_v45, %v5702_v3  ;;  %v4856_v50 = vsub.s32 %v2705_v7, %v5710_v29  ;;  %v2596_v53 = vrot.slane %v4772_v8, 4 }
 0x19b   :  { %5707 = vst [vmem:[#allocation32_spill] sm:$0xff] %v4842_v16  ;;  %5708 = vst [vmem:[#allocation31_spill] sm:$0xff] %v4845_v58  ;;  %v4858_v5 = vadd.f32 %v2472_v2, %v2471_v18  ;;  %v4860_v62 = vadd.f32 %v2490_v14, %v2489_v20  ;;  %v2614_v12 = vrot.slane %v4774_v35, 4  ;;  %v4864_v58 = vpop.f32.mrf.mxu0  ;;  %v4866_v16 = vadd.f32 %v2481_v52, %v2480_v11  ;;  %v4871_v7 = vpop.f32.mrf.mxu1 }
 0x19c   :  { %5709 = vst [vmem:[#allocation36_spill] sm:$0xff] %v4853_v24  ;;  %5711 = vst [vmem:[#allocation33_spill] sm:$0xff] %v4856_v50  ;;  %v1505_v37 = vand.u32 2147483647, %v4638_v51  ;;  %v1507_v45 = vand.u32 2147483647, %v4648_v43  ;;  %v2608_v2 = vadd.f32 %v2607_v26, %v2606_v60  ;;  %v2626_v18 = vadd.f32 %v2625_v40, %v2624_v32 }
 0x19d   :  { %5712 = vst [vmem:[#allocation37_spill] sm:$0xff] %v4858_v5  ;;  %5713 = vst [vmem:[#allocation34_spill] sm:$0xff] %v4860_v62  ;;  %v1506_v3 = vand.u32 2147483647, %v4655_v23  ;;  %v1508_v14 = vand.u32 2147483647, %v4662_v0  ;;  %v4875_v29 = vpop.f32.mrf.mxu0  ;;  %v4877_v50 = vadd.f32 %v2499_v28, %v2498_v25  ;;  %v4882_v52 = vpop.f32.mrf.mxu1  ;;  %v4885_v23 = vadd.f32 %v2596_v53, %v4772_v8 }
 0x19e   :  { %v4893_v25 = vadd.f32 %v2614_v12, %v4774_v35  ;;  %v2609_v8 = vrot.slane %v2608_v2, 1  ;;  %v2627_v53 = vrot.slane %v2626_v18, 1  ;;  %v1677_v0 = vand.u32 2147483647, %v4751_v10  ;;  %v5714_v28 = vld [vmem:[#allocation27_spill] sm:$0xff] }
 0x19f   :  { %v4890_v26 = vpop.f32.mrf.mxu0  ;;  %v4898_v51 = vpop.f32.mrf.mxu1  ;;  %v1679_v11 = vand.u32 2147483647, %v4755_v57  ;;  %v1678_v35 = vand.u32 2147483647, %v4762_v13  ;;  %v1680_v12 = vand.u32 2147483647, %v4766_v36  ;;  %v4910_v43 = vmul.f32 %v5714_v28, %v1505_v37 }
 0x1a0   :  { %v1685_v24 = vand.u32 2147483647, %v4770_v17  ;;  %v1687_v32 = vand.u32 2147483647, %v4782_v61  ;;  %v4918_v47 = vmul.f32 %v4499_v4, %v1507_v45  ;;  %v1686_v57 = vand.u32 2147483647, %v4793_v59 }
 0x1a1   :  { %v4902_v60 = vpop.f32.mrf.mxu0  ;;  %v4907_v40 = vpop.f32.mrf.mxu1  ;;  %5715 = vst [vmem:[#allocation38_spill] sm:$0xff] %v4910_v43  ;;  %v1688_v13 = vand.u32 2147483647, %v4799_v19  ;;  %v1693_v36 = vand.u32 2147483647, %v4805_v33  ;;  %v5717_v37 = vld [vmem:[#allocation20_spill] sm:$0xff]  ;;  %v4928_v20 = vadd.f32 %v2609_v8, %v2608_v2  ;;  %v4930_v17 = vadd.f32 %v2627_v53, %v2626_v18 }
 0x1a2   :  { %5716 = vst [vmem:[#allocation39_spill] sm:$0xff] %v4918_v47  ;;  %v4926_v43 = vmul.f32 %v5717_v37, %v1506_v3  ;;  %v4933_v61 = vmul.f32 %v4780_v9, %v1677_v0  ;;  %v1695_v45 = vand.u32 2147483647, %v4807_v49  ;;  %v5718_v59 = vld [vmem:[#allocation29_spill] sm:$0xff]  ;;  %v5719_v19 = vld [vmem:[#allocation19_spill] sm:$0xff]  ;;  %v4943_v5 = vmul.f32 %v4821_v6, %v1680_v12 }
 0x1a3   :  { %v4915_v10 = vpop.f32.mrf.mxu0  ;;  %v4923_v62 = vpop.f32.mrf.mxu1  ;;  %v4937_v34 = vmul.f32 %v5718_v59, %v1679_v11  ;;  %v4940_v33 = vmul.f32 %v5719_v19, %v1678_v35  ;;  %v1694_v3 = vand.u32 2147483647, %v4812_v56  ;;  %v4947_v18 = vmul.f32 %v4780_v9, %v1685_v24  ;;  %v5722_v11 = vld [vmem:[#allocation21_spill] sm:$0xff] }
 0x1a4   :  { %v4950_v0 = vmul.f32 %v5718_v59, %v1687_v32  ;;  %v1696_v49 = vand.u32 2147483647, %v4816_v46  ;;  %v4954_v53 = vmul.f32 %v5722_v11, %v1508_v14  ;;  %v4957_v35 = vmul.f32 %v5719_v19, %v1686_v57 }
 0x1a5   :  { %v1237_v47 = vpop.f32.mrf.mxu0  ;;  %v1410_v2 = vpop.f32.mrf.mxu1  ;;  %5720 = vst [vmem:[#allocation7_spill] sm:$0xff] %v4947_v18  ;;  %v4960_v12 = vmul.f32 %v4821_v6, %v1688_v13  ;;  %v4963_v56 = vmul.f32 %v4780_v9, %v1693_v36  ;;  %v1701_v24 = vand.u32 2147483647, %v4823_v63  ;;  %v4967_v32 = vmul.f32 %v5718_v59, %v1695_v45 }
 0x1a6   :  { %5721 = vst [vmem:[#allocation22_spill] sm:$0xff] %v4950_v0  ;;  %5723 = vst [vmem:[#allocation18_spill] sm:$0xff] %v4957_v35  ;;  %v1703_v46 = vand.u32 2147483647, %v4828_v1  ;;  %v1702_v14 = vand.u32 2147483647, %v4839_v54  ;;  %v4973_v35 = vmul.f32 %v5719_v19, %v1694_v3  ;;  %v4981_v45 = vmul.f32 %v4821_v6, %v1696_v49 }
 0x1a7   :  { %v1239_v8 = vpop.f32.mrf.mxu0  ;;  %5724 = vst [vmem:[#allocation9_spill] sm:$0xff] %v4963_v56  ;;  %v1412_v18 = vpop.f32.mrf.mxu1  ;;  %5725 = vst [vmem:[#allocation8_spill] sm:$0xff] %v4967_v32  ;;  %v1704_v0 = vand.u32 2147483647, %v4847_v48  ;;  %v1845_v13 = vand.u32 2147483647, %v4864_v58  ;;  %v4989_v3 = vmul.f32 %v4780_v9, %v1701_v24 }
 0x1a8   :  { %5726 = vst [vmem:[#allocation10_spill] sm:$0xff] %v4973_v35  ;;  %v1847_v36 = vand.u32 2147483647, %v4871_v7  ;;  %v1846_v63 = vand.u32 2147483647, %v4875_v29  ;;  %5727 = vst [vmem:[#allocation11_spill] sm:$0xff] %v4981_v45  ;;  %v4997_v49 = vmul.f32 %v5718_v59, %v1703_v46 }
 0x1a9   :  { %v1241_v57 = vpop.f32.mrf.mxu0  ;;  %v4978_v56 = vpop.f32.mrf.mxu1  ;;  %v1848_v1 = vand.u32 2147483647, %v4882_v52  ;;  %v1853_v54 = vand.u32 2147483647, %v4890_v26  ;;  %v1855_v48 = vand.u32 2147483647, %v4898_v51  ;;  %v5000_v52 = vmul.f32 %v5719_v19, %v1702_v14 }
 0x1aa   :  { %5728 = vst [vmem:[#allocation12_spill] sm:$0xff] %v4989_v3  ;;  %v1854_v58 = vand.u32 2147483647, %v4902_v60  ;;  %v1856_v7 = vand.u32 2147483647, %v4907_v40  ;;  %5729 = vst [vmem:[#allocation13_spill] sm:$0xff] %v4997_v49  ;;  %v5003_v51 = vmul.f32 %v4821_v6, %v1704_v0  ;;  %v5012_v40 = vmul.f32 %v4831_v39, %v1847_v36 }
 0x1ab   :  { %v4986_v32 = vpop.f32.mrf.mxu0  ;;  %v1861_v29 = vand.u32 2147483647, %v4915_v10  ;;  %v4994_v35 = vpop.f32.mrf.mxu1  ;;  %5730 = vst [vmem:[#allocation14_spill] sm:$0xff] %v5000_v52  ;;  %v1863_v9 = vand.u32 2147483647, %v4923_v62  ;;  %v5732_v60 = vld [vmem:[#allocation17_spill] sm:$0xff] }
 0x1ac   :  { %5731 = vst [vmem:[#allocation6_spill] sm:$0xff] %v5003_v51  ;;  %v5009_v24 = vmul.f32 %v5732_v60, %v1845_v13  ;;  %v5733_v10 = vld [vmem:[#allocation30_spill] sm:$0xff]  ;;  %v1862_v59 = vand.u32 2147483647, %v1237_v47  ;;  %v5734_v19 = vld [vmem:[#allocation35_spill] sm:$0xff]  ;;  %v5023_v6 = vmul.f32 %v5732_v60, %v1853_v54  ;;  %v5028_v13 = vmul.f32 %v4831_v39, %v1855_v48 }
 0x1ad   :  { %v5006_v26 = vpop.f32.mrf.mxu0  ;;  %v5015_v3 = vmul.f32 %v5733_v10, %v1846_v63  ;;  %v5017_v46 = vpop.f32.mrf.mxu1  ;;  %v5020_v14 = vmul.f32 %v5734_v19, %v1848_v1  ;;  %v1864_v62 = vand.u32 2147483647, %v1410_v2  ;;  %v1869_v0 = vand.u32 2147483647, %v1239_v8 }
 0x1ae   :  { %v5031_v36 = vmul.f32 %v5733_v10, %v1854_v58  ;;  %v5034_v47 = vmul.f32 %v5734_v19, %v1856_v7  ;;  %v5037_v63 = vmul.f32 %v5732_v60, %v1861_v29  ;;  %v5042_v54 = vmul.f32 %v4831_v39, %v1863_v9  ;;  %v5740_v29 = vld [vmem:[#allocation16_spill] sm:$0xff] }
 0x1af   :  { %v5025_v51 = vpop.f32.mrf.mxu0  ;;  %v5039_v1 = vpop.f32.mrf.mxu1  ;;  %v1871_v2 = vand.u32 2147483647, %v1412_v18  ;;  %v2598_v48 = vrot.slane %v4885_v23, 2  ;;  %v2616_v52 = vrot.slane %v4893_v25, 2  ;;  %v5049_v58 = vmul.f32 %v5733_v10, %v1862_v59 }
 0x1b0   :  { %5735 = vst [vmem:[#allocation27_spill] sm:$0xff] %v5031_v36  ;;  %5736 = vst [vmem:[#allocation20_spill] sm:$0xff] %v5034_v47  ;;  %v1870_v7 = vand.u32 2147483647, %v1241_v57  ;;  %v2678_v9 = vadd.f32 %v5740_v29, %v4930_v17  ;;  %v5058_v18 = vmul.f32 %v5734_v19, %v1864_v62  ;;  %v2013_v47 = vand.u32 2147483647, %v4986_v32 }
 0x1b1   :  { %5737 = vst [vmem:[#allocation29_spill] sm:$0xff] %v5037_v63  ;;  %5738 = vst [vmem:[#allocation19_spill] sm:$0xff] %v5042_v54  ;;  %v5044_v8 = vpop.f32.mrf.mxu0  ;;  %v5051_v49 = vpop.f32.mrf.mxu1  ;;  %v2676_v63 = vadd.f32 %v5740_v29, %v4928_v20  ;;  %v5061_v54 = vmul.f32 %v5732_v60, %v1869_v0  ;;  %v2599_v59 = vadd.f32 %v2598_v48, %v4885_v23  ;;  %v5744_v0 = vand.u32 2147483647, %v4669_v15 }
 0x1b2   :  { %5739 = vst [vmem:[#allocation21_spill] sm:$0xff] %v5049_v58  ;;  %5741 = vst [vmem:[#allocation17_spill] sm:$0xff] %v5058_v18  ;;  %v2617_v57 = vadd.f32 %v2616_v52, %v4893_v25  ;;  %v1872_v58 = vand.u32 2147483647, %v4978_v56  ;;  %v2686_v62 = vadd.f32 %v2678_v9, %v4877_v50  ;;  %v5074_v18 = vmul.f32 %v4831_v39, %v1871_v2 }
 0x1b3   :  { %5742 = vst [vmem:[#allocation30_spill] sm:$0xff] %v5061_v54  ;;  %v5063_v45 = vpop.f32.mrf.mxu0  ;;  %v5069_v20 = vpop.f32.mrf.mxu1  ;;  %v2684_v17 = vadd.f32 %v2676_v63, %v4866_v16  ;;  %v5081_v23 = vmul.f32 %v5714_v28, %v5744_v0  ;;  %v2600_v25 = vrot.slane %v2599_v59, 1  ;;  %v5084_v32 = vmul.f32 %v5733_v10, %v1870_v7  ;;  %v5750_v0 = vld [vmem:[#allocation32_spill] sm:$0xff] }
 0x1b4   :  { %5743 = vst [vmem:[#allocation35_spill] sm:$0xff] %v5074_v18  ;;  %v2618_v56 = vrot.slane %v2617_v57, 1  ;;  %v2015_v52 = vand.u32 2147483647, %v4994_v35  ;;  %v5746_v50 = vand.u32 2147483647, %v4676_v55  ;;  %v5108_v55 = vmul.f32 %v5734_v19, %v1872_v58 }
 0x1b5   :  { %v5076_v60 = vpop.f32.mrf.mxu0  ;;  %5745 = vst [vmem:[#allocation40_spill] sm:$0xff] %v5084_v32  ;;  %v5087_v16 = vpop.f32.mrf.mxu1  ;;  %v5747_v63 = vand.u32 2147483647, %v4683_v42  ;;  %v2014_v2 = vand.u32 2147483647, %v5006_v26  ;;  %v2601_v7 = vadd.f32 %v2600_v25, %v2599_v59  ;;  %v5761_v18 = vld [vmem:[#allocation38_spill] sm:$0xff] }
 0x1b6   :  { %v5092_v39 = vmul.f32 %v4499_v4, %v5746_v50  ;;  %v5748_v10 = vand.u32 2147483647, %v4692_v41  ;;  %v2619_v9 = vadd.f32 %v2618_v56, %v2617_v57  ;;  %5749 = vst [vmem:[#allocation41_spill] sm:$0xff] %v5108_v55  ;;  %v2117_v50 = vmul.f32 %v5750_v0, %v2013_v47 }
 0x1b7   :  { %v5097_v15 = vmul.f32 %v5717_v37, %v5747_v63  ;;  %v5100_v48 = vpop.f32.mrf.mxu0  ;;  %v5111_v42 = vpop.f32.mrf.mxu1  ;;  %v5751_v63 = vand.u32 2147483647, %v4699_v30  ;;  %v5752_v32 = vand.u32 2147483647, %v4709_v38  ;;  %v5753_v59 = vand.u32 2147483647, %v4717_v22 }
 0x1b8   :  { %v5105_v35 = vmul.f32 %v5722_v11, %v5748_v10  ;;  %v5754_v47 = vand.u32 2147483647, %v4723_v44  ;;  %v2675_v30 = vadd.f32 %v5740_v29, %v2601_v7  ;;  %v2677_v57 = vadd.f32 %v5740_v29, %v2619_v9  ;;  %v5755_v38 = vld [vmem:[#allocation31_spill] sm:$0xff]  ;;  %v5760_v29 = vld [vmem:[#allocation34_spill] sm:$0xff] }
 0x1b9   :  { %v5116_v26 = vmul.f32 %v5714_v28, %v5751_v63  ;;  %v5121_v41 = vmul.f32 %v4499_v4, %v5752_v32  ;;  %v5123_v10 = vpop.f32.mrf.mxu0  ;;  %v5128_v19 = vmul.f32 %v5717_v37, %v5753_v59  ;;  %v2119_v25 = vmul.f32 %v5755_v38, %v2015_v52  ;;  %v5140_v63 = vpop.f32.mrf.mxu1  ;;  %v5759_v52 = vld [vmem:[#allocation37_spill] sm:$0xff] }
 0x1ba   :  { %v5133_v58 = vmul.f32 %v5722_v11, %v5754_v47  ;;  %v2016_v56 = vand.u32 2147483647, %v5017_v46  ;;  %v2021_v32 = vand.u32 2147483647, %v5025_v51  ;;  %v5756_v22 = vand.u32 2147483647, %v4729_v21 }
 0x1bb   :  { %v5148_v44 = vmul.f32 %v4850_v31, %v2014_v2  ;;  %v1265_v47 = vpop.f32.mrf.mxu0  ;;  %v5758_v7 = vand.u32 2147483647, %v4735_v27  ;;  %v2683_v46 = vadd.f32 %v2675_v30, %v5759_v52  ;;  %v2685_v51 = vadd.f32 %v2677_v57, %v5760_v29  ;;  %v1438_v54 = vpop.f32.mrf.mxu1  ;;  %v5766_v30 = vld [vmem:[#allocation39_spill] sm:$0xff]  ;;  %v5767_v52 = vld [vmem:[#allocation36_spill] sm:$0xff] }
 0x1bc   :  { %v5145_v59 = vmul.f32 %v5714_v28, %v5756_v22  ;;  %v2023_v55 = vand.u32 2147483647, %v5039_v1  ;;  %v1645_v21 = vadd.f32 %v5761_v18, %v1265_v47  ;;  %v5762_v28 = vld [vmem:[#allocation28_spill] sm:$0xff]  ;;  %v5172_v18 = vmul.f32 %v5767_v52, %v2016_v56 }
 0x1bd   :  { %v5153_v9 = vmul.f32 %v4499_v4, %v5758_v7  ;;  %v5763_v22 = vand.u32 2147483647, %v5762_v28  ;;  %v2022_v4 = vand.u32 2147483647, %v5044_v8  ;;  %v1647_v7 = vadd.f32 %v5766_v30, %v1438_v54  ;;  %v1267_v29 = vpop.f32.mrf.mxu0  ;;  %v1440_v28 = vpop.f32.mrf.mxu1  ;;  %v5768_v54 = vld [vmem:[#allocation33_spill] sm:$0xff] }
 0x1be   :  { %5757 = vst [vmem:[#allocation32_spill] sm:$0xff] %v5145_v59  ;;  %v5764_v59 = vld [vmem:[#allocation15_spill] sm:$0xff]  ;;  %v2699_v57 = vcombine.low %v2683_v46, %v2684_v17  ;;  %v2700_v1 = vcombine.low %v2685_v51, %v2686_v62  ;;  %v5175_v47 = vmul.f32 %v5750_v0, %v2021_v32  ;;  %v5188_v62 = vmul.f32 %v5755_v38, %v2023_v55 }
 0x1bf   :  { %v5162_v2 = vmul.f32 %v5717_v37, %v5763_v22  ;;  %v5765_v36 = vand.u32 2147483647, %v5764_v59  ;;  %v1813_v37 = vadd.f32 %v4933_v61, %v1645_v21  ;;  %v1646_v59 = vadd.f32 %v4926_v43, %v1267_v29  ;;  %v1269_v8 = vpop.f32.mrf.mxu0  ;;  %v1442_v32 = vpop.f32.mrf.mxu1 }
 0x1c0   :  { %v5182_v22 = vrot.slane %v2699_v57, %v5768_v54  ;;  %v5185_v17 = vrot.slane %v2700_v1, %v5768_v54  ;;  %v2024_v56 = vand.u32 2147483647, %v5051_v49  ;;  %v2029_v61 = vand.u32 2147483647, %v5063_v45 }
 0x1c1   :  { %v5167_v27 = vmul.f32 %v5722_v11, %v5765_v36  ;;  %v1815_v11 = vadd.f32 %v4937_v34, %v1647_v7  ;;  %v1648_v36 = vadd.f32 %v4954_v53, %v1440_v28  ;;  %v1981_v43 = vadd.f32 %v5009_v24, %v1813_v37  ;;  %v1271_v51 = vpop.f32.mrf.mxu0  ;;  %v1444_v30 = vpop.f32.mrf.mxu1 }
 0x1c2   :  { %v5194_v34 = vmul.f32 %v4850_v31, %v2022_v4  ;;  %v2031_v53 = vand.u32 2147483647, %v5069_v20  ;;  %v1814_v46 = vadd.f32 %v4940_v33, %v1646_v59  ;;  %v2030_v55 = vand.u32 2147483647, %v5076_v60 }
 0x1c3   :  { %v2032_v49 = vand.u32 2147483647, %v5087_v16  ;;  %v1983_v45 = vadd.f32 %v5012_v40, %v1815_v11  ;;  %v1653_v24 = vadd.f32 %v5081_v23, %v1269_v8  ;;  %v2037_v4 = vand.u32 2147483647, %v5100_v48  ;;  %v1275_v29 = vpop.f32.mrf.mxu0  ;;  %v1448_v23 = vpop.f32.mrf.mxu1 }
 0x1c4   :  { %v2039_v7 = vand.u32 2147483647, %v5111_v42  ;;  %v1816_v20 = vadd.f32 %v4943_v5, %v1648_v36  ;;  %v1655_v33 = vadd.f32 %v5092_v39, %v1442_v32  ;;  %v5209_v57 = vmul.f32 %v5767_v52, %v2024_v56 }
 0x1c5   :  { %v5212_v60 = vmul.f32 %v5750_v0, %v2029_v61  ;;  %v5214_v16 = vadd.f32 %v2117_v50, %v1981_v43  ;;  %v1654_v40 = vadd.f32 %v5097_v15, %v1271_v51  ;;  %v5218_v48 = vmul.f32 %v5755_v38, %v2031_v53  ;;  %v1277_v1 = vpop.f32.mrf.mxu0  ;;  %v5769_v15 = vld [vmem:[#allocation7_spill] sm:$0xff]  ;;  %v1450_v11 = vpop.f32.mrf.mxu1 }
 0x1c6   :  { %v2038_v42 = vand.u32 2147483647, %v5123_v10  ;;  %v1982_v5 = vadd.f32 %v5015_v3, %v1814_v46  ;;  %v1656_v39 = vadd.f32 %v5105_v35, %v1444_v30  ;;  %v5224_v37 = vmul.f32 %v4850_v31, %v2030_v55  ;;  %v5770_v35 = vld [vmem:[#allocation22_spill] sm:$0xff] }
 0x1c7   :  { %v5227_v59 = vmul.f32 %v5767_v52, %v2032_v49  ;;  %v5229_v50 = vadd.f32 %v2119_v25, %v1983_v45  ;;  %v1821_v28 = vadd.f32 %v5769_v15, %v1653_v24  ;;  %v5233_v36 = vmul.f32 %v5750_v0, %v2037_v4  ;;  %v1279_v56 = vpop.f32.mrf.mxu0  ;;  %v5771_v25 = vld [vmem:[#allocation18_spill] sm:$0xff]  ;;  %v1452_v46 = vpop.f32.mrf.mxu1  ;;  %v5772_v24 = vld [vmem:[#allocation9_spill] sm:$0xff] }
 0x1c8   :  { %v5236_v10 = vmul.f32 %v5755_v38, %v2039_v7  ;;  %v1984_v3 = vadd.f32 %v5020_v14, %v1816_v20  ;;  %v1823_v8 = vadd.f32 %v5770_v35, %v1655_v33  ;;  %v2040_v61 = vand.u32 2147483647, %v5140_v63  ;;  %v5773_v7 = vld [vmem:[#allocation8_spill] sm:$0xff] }
 0x1c9   :  { %v2213_v43 = vmin.f32 %v5214_v16, 0.0  ;;  %v1822_v32 = vadd.f32 %v5771_v25, %v1654_v40  ;;  %v1661_v53 = vadd.f32 %v5116_v26, %v1275_v29  ;;  %v5245_v0 = vmul.f32 %v4850_v31, %v2038_v42  ;;  %v1281_v55 = vpop.f32.mrf.mxu0  ;;  %v1454_v4 = vpop.f32.mrf.mxu1  ;;  %v5774_v29 = vld [vmem:[#allocation27_spill] sm:$0xff]  ;;  %v5776_v42 = vld [vmem:[#allocation32_spill] sm:$0xff] }
 0x1ca   :  { %v5248_v38 = vadd.f32 %v5148_v44, %v1982_v5  ;;  %v1824_v14 = vadd.f32 %v4960_v12, %v1656_v39  ;;  %v1663_v51 = vadd.f32 %v5121_v41, %v1448_v23  ;;  %v2215_v49 = vmin.f32 %v5229_v50, 0.0  ;;  %v5777_v39 = vld [vmem:[#allocation20_spill] sm:$0xff] }
 0x1cb   :  { %v1989_v45 = vadd.f32 %v5023_v6, %v1821_v28  ;;  %v1829_v30 = vadd.f32 %v5772_v24, %v1661_v53  ;;  %v1662_v26 = vadd.f32 %v5128_v19, %v1277_v1  ;;  %v5257_v31 = vadd.f32 %v5172_v18, %v1984_v3  ;;  %v5262_v41 = vpop.f32.mrf.mxu0  ;;  %v5775_v6 = vld [vmem:[#allocation10_spill] sm:$0xff]  ;;  %v5267_v19 = vpop.f32.mrf.mxu1  ;;  %v5779_v3 = vld [vmem:[#allocation29_spill] sm:$0xff]  ;;  %v5781_v53 = vld [vmem:[#allocation19_spill] sm:$0xff] }
 0x1cc   :  { %v1991_v44 = vadd.f32 %v5028_v13, %v1823_v8  ;;  %v1831_v20 = vadd.f32 %v5773_v7, %v1663_v51  ;;  %v1664_v12 = vadd.f32 %v5133_v58, %v1450_v11  ;;  %v2249_v33 = vmul.f32 1.442695, %v2213_v43  ;;  %v5778_v13 = vld [vmem:[#allocation11_spill] sm:$0xff]  ;;  %v5780_v8 = vld [vmem:[#allocation12_spill] sm:$0xff]  ;;  %v5782_v51 = vld [vmem:[#allocation13_spill] sm:$0xff] }
 0x1cd   :  { %v1990_v40 = vadd.f32 %v5774_v29, %v1822_v32  ;;  %v1830_v23 = vadd.f32 %v5775_v6, %v1662_v26  ;;  %v1669_v5 = vadd.f32 %v5776_v42, %v1279_v56  ;;  %v2214_v18 = vmin.f32 %v5248_v38, 0.0  ;;  %v5273_v58 = vpop.f32.mrf.mxu0  ;;  %v5281_v25 = vpop.f32.mrf.mxu1 }
 0x1ce   :  { %v1992_v1 = vadd.f32 %v5777_v39, %v1824_v14  ;;  %v1832_v15 = vadd.f32 %v5778_v13, %v1664_v12  ;;  %v1671_v28 = vadd.f32 %v5153_v9, %v1452_v46  ;;  %v5276_v11 = vadd.f32 %v5175_v47, %v1989_v45  ;;  %v5786_v12 = vld [vmem:[#allocation30_spill] sm:$0xff] }
 0x1cf   :  { %v1997_v35 = vadd.f32 %v5779_v3, %v1829_v30  ;;  %v1837_v43 = vadd.f32 %v5780_v8, %v1669_v5  ;;  %v1670_v56 = vadd.f32 %v5162_v2, %v1281_v55  ;;  %v5284_v32 = vadd.f32 %v5188_v62, %v1991_v44  ;;  %v5289_v24 = vpop.f32.mrf.mxu0  ;;  %v5783_v30 = vld [vmem:[#allocation21_spill] sm:$0xff]  ;;  %v5784_v55 = vld [vmem:[#allocation14_spill] sm:$0xff]  ;;  %v5297_v7 = vpop.f32.mrf.mxu1 }
 0x1d0   :  { %v1999_v14 = vadd.f32 %v5781_v53, %v1831_v20  ;;  %v1839_v9 = vadd.f32 %v5782_v51, %v1671_v28  ;;  %v1672_v46 = vadd.f32 %v5167_v27, %v1454_v4  ;;  %v2216_v47 = vmin.f32 %v5257_v31, 0.0  ;;  %v5785_v44 = vld [vmem:[#allocation17_spill] sm:$0xff]  ;;  %v5787_v4 = vld [vmem:[#allocation6_spill] sm:$0xff] }
 0x1d1   :  { %v5293_v45 = vadd.f32 %v5194_v34, %v1990_v40  ;;  %v1998_v2 = vadd.f32 %v5783_v30, %v1830_v23  ;;  %v1838_v26 = vadd.f32 %v5784_v55, %v1670_v56  ;;  %v5300_v62 = vadd.f32 %v5209_v57, %v1992_v1  ;;  %v5305_v6 = vpop.f32.mrf.mxu0  ;;  %v5788_v23 = vld [vmem:[#allocation35_spill] sm:$0xff]  ;;  %v5312_v39 = vpop.f32.mrf.mxu1 }
 0x1d2   :  { %v2000_v20 = vadd.f32 %v5785_v44, %v1832_v15  ;;  %v2005_v27 = vadd.f32 %v5786_v12, %v1837_v43  ;;  %v1840_v29 = vadd.f32 %v5787_v4, %v1672_v46  ;;  %v2253_v42 = vmul.f32 1.442695, %v2215_v49  ;;  %v5789_v15 = vld [vmem:[#allocation40_spill] sm:$0xff] }
 0x1d3   :  { %v2221_v34 = vmin.f32 %v5276_v11, 0.0  ;;  %v5309_v40 = vadd.f32 %v5212_v60, %v1997_v35  ;;  %v2007_v5 = vadd.f32 %v5788_v23, %v1839_v9  ;;  %v2251_v57 = vmul.f32 1.442695, %v2214_v18  ;;  %v5319_v3 = vpop.f32.mrf.mxu0  ;;  %v5790_v35 = vld [vmem:[#allocation41_spill] sm:$0xff]  ;;  %v5326_v56 = vpop.f32.mrf.mxu1 }
 0x1d4   :  { %v2223_v1 = vmin.f32 %v5284_v32, 0.0  ;;  %v5316_v13 = vadd.f32 %v5218_v48, %v1999_v14  ;;  %v2006_v28 = vadd.f32 %v5789_v15, %v1838_v26  ;;  %v2255_v49 = vmul.f32 1.442695, %v2216_v47 }
 0x1d5   :  { %v2222_v8 = vmin.f32 %v5293_v45, 0.0  ;;  %v5323_v60 = vadd.f32 %v5224_v37, %v1998_v2  ;;  %v2008_v43 = vadd.f32 %v5790_v35, %v1840_v29  ;;  %v2224_v18 = vmin.f32 %v5300_v62, 0.0  ;;  %v5335_v14 = vpop.f32.mrf.mxu0  ;;  %v5344_v47 = vpop.f32.mrf.mxu1 }
 0x1d6   :  { %v5330_v53 = vadd.f32 %v5227_v59, %v2000_v20  ;;  %v5333_v48 = vadd.f32 %v5233_v36, %v2005_v27  ;;  %3253 = vpow2.f32 %v2249_v33  ;;  %v2144_v37 = vmul.f32 %v5767_v52, %v2040_v61 }
 0x1d7   :  { %v2265_v51 = vmul.f32 1.442695, %v2221_v34  ;;  %v2229_v9 = vmin.f32 %v5309_v40, 0.0  ;;  %v5342_v46 = vadd.f32 %v5236_v10, %v2007_v5  ;;  %v2269_v59 = vmul.f32 1.442695, %v2223_v1  ;;  %v5350_v33 = vpop.f32.mrf.mxu0  ;;  %v5355_v2 = vpop.f32.mrf.mxu1 }
 0x1d8   :  { %v2231_v30 = vmin.f32 %v5316_v13, 0.0  ;;  %v5348_v36 = vadd.f32 %v5245_v0, %v2006_v28  ;;  %3255 = vpow2.f32 %v2253_v42  ;;  %v2267_v63 = vmul.f32 1.442695, %v2222_v8 }
 0x1d9   :  { %v2230_v52 = vmin.f32 %v5323_v60, 0.0  ;;  %v5353_v61 = vadd.f32 %v2144_v37, %v2008_v43  ;;  %3257 = vpow2.f32 %v2251_v57  ;;  %v2271_v10 = vmul.f32 1.442695, %v2224_v18  ;;  %v5359_v44 = vpop.f32.mrf.mxu0  ;;  %v5362_v12 = vpop.f32.mrf.mxu1 }
 0x1da   :  { %v2232_v55 = vmin.f32 %v5330_v53, 0.0  ;;  %v2237_v26 = vmin.f32 %v5333_v48, 0.0  ;;  %3259 = vpow2.f32 %v2255_v49  ;;  %v2281_v0 = vmul.f32 1.442695, %v2229_v9 }
 0x1db   :  { %v2239_v20 = vmin.f32 %v5342_v46, 0.0  ;;  %3261 = vpow2.f32 %v2265_v51  ;;  %v2285_v27 = vmul.f32 1.442695, %v2231_v30  ;;  %v2238_v4 = vmin.f32 %v5348_v36, 0.0  ;;  %v5365_v29 = vpop.f32.mrf.mxu0  ;;  %v5372_v28 = vpop.f32.mrf.mxu1 }
 0x1dc   :  { %3263 = vpow2.f32 %v2269_v59  ;;  %v2283_v42 = vmul.f32 1.442695, %v2230_v52  ;;  %v2240_v34 = vmin.f32 %v5353_v61, 0.0  ;;  %vm2181_vm1 = vcmp.gt.f32.partialorder %v5214_v16, 0.0 }
 0x1dd   :  { %3265 = vpow2.f32 %v2267_v63  ;;  %v2287_v23 = vmul.f32 1.442695, %v2232_v55  ;;  %v2297_v5 = vmul.f32 1.442695, %v2237_v26  ;;  %v2373_v57 = vand.u32 2147483647, %v5262_v41  ;;  %v5374_v49 = vpop.f32.mrf.mxu0  ;;  %v5387_v63 = vpop.f32.mrf.mxu1 }
 0x1de   :  { %3267 = vpow2.f32 %v2271_v10  ;;  %v2301_v1 = vmul.f32 1.442695, %v2239_v20  ;;  %vm2183_vm2 = vcmp.gt.f32.partialorder %v5229_v50, 0.0  ;;  %v2375_v15 = vand.u32 2147483647, %v5267_v19 }
 0x1df   :  { %3269 = vpow2.f32 %v2281_v0  ;;  %v2299_v8 = vmul.f32 1.442695, %v2238_v4  ;;  %vm2182_vm3 = vcmp.gt.f32.partialorder %v5248_v38, 0.0  ;;  %v2374_v35 = vand.u32 2147483647, %v5273_v58  ;;  %v1309_v52 = vpop.f32.mrf.mxu0 }
 0x1e0   :  { %3271 = vpow2.f32 %v2285_v27  ;;  %v2303_v43 = vmul.f32 1.442695, %v2240_v34  ;;  %vm2184_vm4 = vcmp.gt.f32.partialorder %v5257_v31, 0.0  ;;  %v2376_v41 = vand.u32 2147483647, %v5281_v25  ;;  %v5404_v27 = vpop.f32.mrf.mxu1 }
 0x1e1   :  { %3273 = vpow2.f32 %v2283_v42  ;;  %vm2189_vm5 = vcmp.gt.f32.partialorder %v5276_v11, 0.0  ;;  %v2381_v18 = vand.u32 2147483647, %v5289_v24  ;;  %v2383_v37 = vand.u32 2147483647, %v5297_v7 }
 0x1e2   :  { %3275 = vpow2.f32 %v2287_v23  ;;  %vm2191_vm6 = vcmp.gt.f32.partialorder %v5284_v32, 0.0  ;;  %v2382_v9 = vand.u32 2147483647, %v5305_v6  ;;  %v2384_v59 = vand.u32 2147483647, %v5312_v39 }
 0x1e3   :  { %v3254_v51 = vpop.eup %3253  ;;  %v2389_v30 = vand.u32 2147483647, %v5319_v3  ;;  %3277 = vpow2.f32 %v2297_v5  ;;  %vm2190_vm7 = vcmp.gt.f32.partialorder %v5293_v45, 0.0  ;;  %v2391_v24 = vand.u32 2147483647, %v5326_v56 }
 0x1e4   :  { %v2902_v10 = vadd.f32 -1.0, %v3254_v51  ;;  %v2390_v55 = vand.u32 2147483647, %v5335_v14  ;;  %3279 = vpow2.f32 %v2301_v1  ;;  %vm2192_vm8 = vcmp.gt.f32.partialorder %v5300_v62, 0.0 }
 0x1e5   :  { %v3256_v26 = vpop.eup %3255  ;;  %3281 = vpow2.f32 %v2299_v8  ;;  %vm2197_vm9 = vcmp.gt.f32.partialorder %v5309_v40, 0.0  ;;  %v2413_v23 = vmax.f32 %v1309_v52, 0.0  ;;  %vm2199_vm10 = vcmp.gt.f32.partialorder %v5316_v13, 0.0  ;;  %v5791_v52 = vld [vmem:[#allocation24_spill] sm:$0xff] }
 0x1e6   :  { %v3258_v4 = vpop.eup %3257  ;;  %v2341_v42 = vsel %vm2181_vm1, %v5214_v16, %v2902_v10  ;;  %v2904_v34 = vadd.f32 -1.0, %v3256_v26  ;;  %3283 = vpow2.f32 %v2303_v43  ;;  %vm2198_vm11 = vcmp.gt.f32.partialorder %v5323_v60, 0.0  ;;  %v5412_v26 = vpop.f32.mrf.mxu0 }
 0x1e7   :  { %v3260_v5 = vpop.eup %3259  ;;  %v2903_v1 = vadd.f32 -1.0, %v3258_v4  ;;  %v2437_v21 = vmul.f32 %v2373_v57, %v2341_v42  ;;  %vm2200_vm12 = vcmp.gt.f32.partialorder %v5330_v53, 0.0  ;;  %vm2205_vm13 = vcmp.gt.f32.partialorder %v5333_v48, 0.0 }
 0x1e8   :  { %v3262_v20 = vpop.eup %3261  ;;  %v2343_v16 = vsel %vm2183_vm2, %v5229_v50, %v2904_v34  ;;  %v2905_v10 = vadd.f32 -1.0, %v3260_v5  ;;  %v5424_v0 = vmul.f32 %v5791_v52, %v2413_v23  ;;  %v2415_v57 = vmax.f32 %v5404_v27, 0.0 }
 0x1e9   :  { %v3264_v4 = vpop.eup %3263  ;;  %v2342_v8 = vsel %vm2182_vm3, %v5248_v38, %v2903_v1  ;;  %v2910_v51 = vadd.f32 -1.0, %v3262_v20  ;;  %v2439_v38 = vmul.f32 %v2375_v15, %v2343_v16  ;;  %vm2207_vm14 = vcmp.gt.f32.partialorder %v5342_v46, 0.0  ;;  %v5440_v15 = vpop.f32.mrf.mxu1 }
 0x1ea   :  { %v3266_v34 = vpop.eup %3265  ;;  %v2344_v5 = vsel %vm2184_vm4, %v5257_v31, %v2905_v10  ;;  %v2912_v43 = vadd.f32 -1.0, %v3264_v4  ;;  %v2414_v31 = vmax.f32 %v5412_v26, 0.0  ;;  %v2438_v23 = vmul.f32 %v2374_v35, %v2342_v8 }
 0x1eb   :  { %v3268_v42 = vpop.eup %3267  ;;  %v2349_v20 = vsel %vm2189_vm5, %v5276_v11, %v2910_v51  ;;  %v2911_v1 = vadd.f32 -1.0, %v3266_v34  ;;  %vm2206_vm15 = vcmp.gt.f32.partialorder %v5348_v36, 0.0  ;;  %v2440_v51 = vmul.f32 %v2376_v41, %v2344_v5  ;;  %v1315_v34 = vpop.f32.mrf.mxu0 }
 0x1ec   :  { %v3270_v10 = vpop.eup %3269  ;;  %v2445_v4 = vmul.f32 %v2381_v18, %v2349_v20  ;;  %v2351_v50 = vsel %vm2191_vm6, %v5284_v32, %v2912_v43  ;;  %v2913_v19 = vadd.f32 -1.0, %v3268_v42  ;;  %vm2208_vm0 = vcmp.gt.f32.partialorder %v5353_v61, 0.0  ;;  %v1488_v42 = vpop.f32.mrf.mxu1 }
 0x1ed   :  { %v3272_v11 = vpop.eup %3271  ;;  %v2447_v16 = vmul.f32 %v2383_v37, %v2351_v50  ;;  %v2350_v58 = vsel %vm2190_vm7, %v5293_v45, %v2911_v1  ;;  %v2918_v35 = vadd.f32 -1.0, %v3270_v10  ;;  %v5792_v56 = vand.u32 2147483647, %v5344_v47 }
 0x1ee   :  { %v3274_v32 = vpop.eup %3273  ;;  %v2501_v18 = vadd.f32 %v2445_v4, %v2437_v21  ;;  %v2446_v8 = vmul.f32 %v2382_v9, %v2350_v58  ;;  %v2352_v25 = vsel %vm2192_vm8, %v5300_v62, %v2913_v19  ;;  %v2920_v41 = vadd.f32 -1.0, %v3272_v11  ;;  %v1317_v11 = vpop.f32.mrf.mxu0 }
 0x1ef   :  { %v3276_v43 = vpop.eup %3275  ;;  %v2519_v7 = vadd.f32 %v2447_v16, %v2439_v38  ;;  %v2448_v37 = vmul.f32 %v2384_v59, %v2352_v25  ;;  %v2357_v45 = vsel %vm2197_vm9, %v5309_v40, %v2918_v35  ;;  %v2919_v50 = vadd.f32 -1.0, %v3274_v32  ;;  %v1490_v58 = vpop.f32.mrf.mxu1 }
 0x1f0   :  { %v3278_v21 = vpop.eup %3277  ;;  %v2510_v5 = vadd.f32 %v2446_v8, %v2438_v23  ;;  %v2453_v6 = vmul.f32 %v2389_v30, %v2357_v45  ;;  %v2359_v62 = vsel %vm2199_vm10, %v5316_v13, %v2920_v41  ;;  %v2921_v9 = vadd.f32 -1.0, %v3276_v43  ;;  %v1319_v45 = vpop.f32.mrf.mxu0 }
 0x1f1   :  { %v3280_v38 = vpop.eup %3279  ;;  %v2528_v39 = vadd.f32 %v2448_v37, %v2440_v51  ;;  %v2455_v59 = vmul.f32 %v2391_v24, %v2359_v62  ;;  %v2358_v40 = vsel %vm2198_vm11, %v5323_v60, %v2919_v50  ;;  %v2926_v20 = vadd.f32 -1.0, %v3278_v21 }
 0x1f2   :  { %v3282_v1 = vpop.eup %3281  ;;  %v2502_v10 = vadd.f32 %v2501_v18, %v2453_v6  ;;  %v2454_v3 = vmul.f32 %v2390_v55, %v2358_v40  ;;  %v2360_v13 = vsel %vm2200_vm12, %v5330_v53, %v2921_v9  ;;  %v2928_v30 = vadd.f32 -1.0, %v3280_v38 }
 0x1f3   :  { %v3284_v23 = vpop.eup %3283  ;;  %v2520_v4 = vadd.f32 %v2519_v7, %v2455_v59  ;;  %v2456_v24 = vmul.f32 %v5792_v56, %v2360_v13  ;;  %v2365_v60 = vsel %vm2205_vm13, %v5333_v48, %v2926_v20  ;;  %v2927_v19 = vadd.f32 -1.0, %v3282_v1  ;;  %v1321_v1 = vpop.f32.mrf.mxu0 }
 0x1f4   :  { %v2511_v51 = vadd.f32 %v2510_v5, %v2454_v3  ;;  %v5793_v14 = vand.u32 2147483647, %v5350_v33  ;;  %v2367_v53 = vsel %vm2207_vm14, %v5342_v46, %v2928_v30  ;;  %v2929_v16 = vadd.f32 -1.0, %v3284_v23  ;;  %v1492_v5 = vpop.f32.mrf.mxu1 }
 0x1f5   :  { %v2529_v35 = vadd.f32 %v2528_v39, %v2456_v24  ;;  %v5794_v47 = vand.u32 2147483647, %v5355_v2  ;;  %v2366_v48 = vsel %vm2206_vm15, %v5348_v36, %v2927_v19  ;;  %v2416_v18 = vmax.f32 %v5440_v15, 0.0 }
 0x1f6   :  { %v2461_v55 = vmul.f32 %v5793_v14, %v2365_v60  ;;  %v5795_v33 = vand.u32 2147483647, %v5359_v44  ;;  %v2368_v46 = vsel %vm2208_vm0, %v5353_v61, %v2929_v16  ;;  %v2421_v41 = vmax.f32 %v1315_v34, 0.0  ;;  %v5798_v44 = vld [vmem:[#allocation23_spill] sm:$0xff]  ;;  %v1494_v13 = vpop.f32.mrf.mxu1  ;;  %v5803_v60 = vld [vmem:[#allocation26_spill] sm:$0xff] }
 0x1f7   :  { %v2463_v32 = vmul.f32 %v5794_v47, %v2367_v53  ;;  %v5796_v7 = vand.u32 2147483647, %v5362_v12  ;;  %v2575_v37 = vmul.f32 %v5791_v52, %v2415_v57  ;;  %v2423_v36 = vmax.f32 %v1488_v42, 0.0 }
 0x1f8   :  { %v2503_v8 = vadd.f32 %v2502_v10, %v2461_v55  ;;  %v2462_v25 = vmul.f32 %v5795_v33, %v2366_v48  ;;  %v5797_v50 = vmax.f32 %v5365_v29, 0.0  ;;  %v2574_v61 = vmul.f32 %v5791_v52, %v2414_v31  ;;  %v5802_v31 = vld [vmem:[#allocation25_spill] sm:$0xff] }
 0x1f9   :  { %v2521_v43 = vadd.f32 %v2520_v4, %v2463_v32  ;;  %v2464_v2 = vmul.f32 %v5796_v7, %v2368_v46  ;;  %v2422_v34 = vmax.f32 %v1317_v11, 0.0  ;;  %v5799_v12 = vmax.f32 %v5372_v28, 0.0 }
 0x1fa   :  { %v2512_v15 = vadd.f32 %v2511_v51, %v2462_v25  ;;  %v2565_v21 = vmul.f32 %v5798_v44, %v5797_v50  ;;  %v2576_v57 = vmul.f32 %v5791_v52, %v2416_v18  ;;  %v2424_v62 = vmax.f32 %v1490_v58, 0.0 }
 0x1fb   :  { %v2530_v6 = vadd.f32 %v2529_v35, %v2464_v2  ;;  %v2567_v27 = vmul.f32 %v5798_v44, %v5799_v12  ;;  %v2504_v9 = vrot.slane %v2503_v8, 4  ;;  %v5800_v42 = vmax.f32 %v5374_v49, 0.0 }
 0x1fc   :  { %v5801_v38 = vmax.f32 %v5387_v63, 0.0  ;;  %v2581_v39 = vmul.f32 %v5802_v31, %v2421_v41  ;;  %v2522_v59 = vrot.slane %v2521_v43, 4  ;;  %v2629_v40 = vadd.f32 %v5424_v0, %v2565_v21 }
 0x1fd   :  { %v2566_v29 = vmul.f32 %v5798_v44, %v5800_v42  ;;  %v2647_v28 = vadd.f32 %v2575_v37, %v2567_v27  ;;  %v2583_v20 = vmul.f32 %v5802_v31, %v2423_v36  ;;  %v2513_v52 = vrot.slane %v2512_v15, 4 }
 0x1fe   :  { %v2568_v26 = vmul.f32 %v5798_v44, %v5801_v38  ;;  %v2582_v3 = vmul.f32 %v5802_v31, %v2422_v34  ;;  %v2429_v49 = vmax.f32 %v1319_v45, 0.0  ;;  %v2531_v30 = vrot.slane %v2530_v6, 4 }
 0x1ff   :  { %v2638_v10 = vadd.f32 %v2574_v61, %v2566_v29  ;;  %v2584_v63 = vmul.f32 %v5802_v31, %v2424_v62  ;;  %v2431_v4 = vmax.f32 %v1492_v5, 0.0  ;;  %v2505_v56 = vadd.f32 %v2504_v9, %v2503_v8 }
 0x200   :  { %v2656_v23 = vadd.f32 %v2576_v57, %v2568_v26  ;;  %v2630_v24 = vadd.f32 %v2629_v40, %v2581_v39  ;;  %v2589_v19 = vmul.f32 %v5803_v60, %v2429_v49  ;;  %v2430_v0 = vmax.f32 %v1321_v1, 0.0 }
 0x201   :  { %v2523_v11 = vadd.f32 %v2522_v59, %v2521_v43  ;;  %v2648_v51 = vadd.f32 %v2647_v28, %v2583_v20  ;;  %v2591_v14 = vmul.f32 %v5803_v60, %v2431_v4  ;;  %v2432_v55 = vmax.f32 %v1494_v13, 0.0 }
 0x202   :  { %v2514_v53 = vadd.f32 %v2513_v52, %v2512_v15  ;;  %v2639_v16 = vadd.f32 %v2638_v10, %v2582_v3  ;;  %v2631_v58 = vadd.f32 %v2630_v24, %v2589_v19  ;;  %v2590_v35 = vmul.f32 %v5803_v60, %v2430_v0  ;;  %v5804_v10 = vld [vmem:[#allocation16_spill] sm:$0xff] }
 0x203   :  { %v2532_v47 = vadd.f32 %v2531_v30, %v2530_v6  ;;  %v2657_v32 = vadd.f32 %v2656_v23, %v2584_v63  ;;  %v2649_v48 = vadd.f32 %v2648_v51, %v2591_v14  ;;  %v2592_v18 = vmul.f32 %v5803_v60, %v2432_v55 }
 0x204   :  { %v2632_v8 = vrot.slane %v2631_v58, 4  ;;  %v2640_v33 = vadd.f32 %v2639_v16, %v2590_v35  ;;  %v2506_v41 = vrot.slane %v2505_v56, 2  ;;  %v2515_v43 = vrot.slane %v2514_v53, 2 }
 0x205   :  { %v2650_v25 = vrot.slane %v2649_v48, 4  ;;  %v2658_v46 = vadd.f32 %v2657_v32, %v2592_v18  ;;  %v2524_v37 = vrot.slane %v2523_v11, 2  ;;  %v2533_v36 = vrot.slane %v2532_v47, 2 }
 0x206   :  { %v2633_v7 = vadd.f32 %v2632_v8, %v2631_v58  ;;  %v2641_v2 = vrot.slane %v2640_v33, 4  ;;  %v2507_v34 = vadd.f32 %v2506_v41, %v2505_v56  ;;  %v2516_v5 = vadd.f32 %v2515_v43, %v2514_v53 }
 0x207   :  { %v2651_v45 = vadd.f32 %v2650_v25, %v2649_v48  ;;  %v2659_v15 = vrot.slane %v2658_v46, 4  ;;  %v2525_v27 = vadd.f32 %v2524_v37, %v2523_v11  ;;  %v2534_v57 = vadd.f32 %v2533_v36, %v2532_v47 }
 0x208   :  { %v2634_v50 = vrot.slane %v2633_v7, 2  ;;  %v2642_v44 = vadd.f32 %v2641_v2, %v2640_v33  ;;  %v2508_v31 = vrot.slane %v2507_v34, 1  ;;  %v2517_v39 = vrot.slane %v2516_v5, 1 }
 0x209   :  { %v2652_v21 = vrot.slane %v2651_v45, 2  ;;  %v2660_v61 = vadd.f32 %v2659_v15, %v2658_v46  ;;  %v2526_v28 = vrot.slane %v2525_v27, 1  ;;  %v2535_v20 = vrot.slane %v2534_v57, 1 }
 0x20a   :  { %v2635_v6 = vadd.f32 %v2634_v50, %v2633_v7  ;;  %v2643_v12 = vrot.slane %v2642_v44, 2  ;;  %v2509_v23 = vadd.f32 %v2508_v31, %v2507_v34  ;;  %v2518_v63 = vadd.f32 %v2517_v39, %v2516_v5 }
 0x20b   :  { %v2653_v62 = vadd.f32 %v2652_v21, %v2651_v45  ;;  %v2661_v9 = vrot.slane %v2660_v61, 2  ;;  %v2527_v56 = vadd.f32 %v2526_v28, %v2525_v27  ;;  %v2536_v24 = vadd.f32 %v2535_v20, %v2534_v57 }
 0x20c   :  { %v2636_v42 = vrot.slane %v2635_v6, 1  ;;  %v2644_v29 = vadd.f32 %v2643_v12, %v2642_v44  ;;  %v5805_v35 = vcombine.low %v5182_v22, %v5185_v17 }
 0x20d   :  { %v2654_v38 = vrot.slane %v2653_v62, 1  ;;  %v2662_v26 = vadd.f32 %v2661_v9, %v2660_v61 }
 0x20e   :  { %v2637_v59 = vadd.f32 %v2636_v42, %v2635_v6  ;;  %v2645_v40 = vrot.slane %v2644_v29, 1  ;;  %v2739_v47 = vrot.slane %v5805_v35, %v5768_v54 }
 0x20f   :  { %v2655_v1 = vadd.f32 %v2654_v38, %v2653_v62  ;;  %v2663_v52 = vrot.slane %v2662_v26, 1 }
 0x210   :  { %v2679_v3 = vadd.f32 %v5804_v10, %v2637_v59  ;;  %v2646_v49 = vadd.f32 %v2645_v40, %v2644_v29 }
 0x211   :  { %v2681_v13 = vadd.f32 %v5804_v10, %v2655_v1  ;;  %v2664_v30 = vadd.f32 %v2663_v52, %v2662_v26 }
 0x212   :  { %v2680_v4 = vadd.f32 %v5804_v10, %v2646_v49  ;;  %v2687_v19 = vadd.f32 %v2679_v3, %v2509_v23 }
 0x213   :  { %v2682_v60 = vadd.f32 %v5804_v10, %v2664_v30  ;;  %v2689_v11 = vadd.f32 %v2681_v13, %v2527_v56 }
 0x214   :  { %v2688_v0 = vadd.f32 %v2680_v4, %v2518_v63 }
 0x215   :  { %v2690_v51 = vadd.f32 %v2682_v60, %v2536_v24 }
 0x216   :  { %v2701_v14 = vcombine.low %v2687_v19, %v2688_v0 }
 0x217   :  { %v2702_v55 = vcombine.low %v2689_v11, %v2690_v51 }
 0x218   :  { %v2723_v53 = vrot.slane %v2701_v14, %v5768_v54 }
 0x219   :  { %v2730_v16 = vrot.slane %v2702_v55, %v5768_v54 }
 0x21b   :  { %v2732_v58 = vcombine.low %v2723_v53, %v2730_v16 }
 0x21d   :  { %v2746_v32 = vrot.slane %v2732_v58, %v5768_v54 }
 0x21f   :  { %v2747_v48 = vcombine.low %v2739_v47, %v2746_v32 }
 0x221   :  { %2749 = vst [vmem:[#allocation3] sm:$0xff] %v2747_v48 }
 0x222   :  { %3298 = shalt.err (!%p3295_p4)
}
 0x223   :  { %2759 = dma.vmem_to_hbm [thread:$0]  %s2757_s11, 128, %s5545_s5, [#allocation4]  }
 0x224   :  { %3307 = dma.done.wait [#allocation4], 128  }
 0x225   :  { %3308 = vsyncadd [#allocation4], 4294967168 }
 0x226   :  { %2763 = vsyncpa [#allocation4], 1 }

</bundles_post_ra>
